<compile_context>
chip_gen: v7x
topology: tpu7x:2x2x1
jax: 0.10.0
libtpu: 0.0.40
codegen_flags: <defaults>
</compile_context>

<pallas_src>
import functools

import jax
import jax.numpy as jnp
from jax import lax
from jax.experimental import pallas as pl
from jax.experimental.pallas import tpu as pltpu


def _make_relu_conv_kernel(K: int, TH: int, W: int):
    def kernel(xp_ref, w_ref, b_ref, o_ref):
        # xp_ref : (1, Hp, Wp, Cin)   bf16, full padded image of batch elem n
        # w_ref  : (K*K, Cin, TCo)    bf16, BN scale already folded in
        # b_ref  : (1, TCo)           f32, folded BN bias
        # o_ref  : (1, TH*W, TCo)     f32, one H-tile of the flattened output
        _, _, _, Cin = xp_ref.shape
        _, _, TCo = w_ref.shape

        h = pl.program_id(2)                      # H-tile index
        row0 = pl.multiple_of(h * TH, TH)         # first output row of this tile

        acc = jnp.zeros((TH * W, TCo), jnp.float32)
        # 3x3 conv as 9 shifted matmuls on the MXU, f32 accumulation.
        for kh in range(K):
            for kw in range(K):
                patch = xp_ref[0, pl.ds(row0 + kh, TH), kw:kw + W, :]   # (TH, W, Cin)
                acc = acc + jnp.dot(
                    patch.reshape(TH * W, Cin), w_ref[kh * K + kw],
                    preferred_element_type=jnp.float32)

        y = jnp.maximum(acc + b_ref[...], 0.0)    # folded BN bias + ReLU (f32)
        o_ref[0] = y.astype(o_ref.dtype)

    return kernel


def _largest_tile_h(H, W, cap):
    cap = max(1, min(int(cap), H))
    for th in range(cap, 0, -1):
        if H % th == 0 and ((th * W) % 8 == 0 or th == H):
            return th
    return H


def relu_conv(x_nchw, weight_oihw, gamma, beta, running_mean, running_var,
              *, k=3, stride=1, pad=1, eps=1e-5,
              tile_h=None, tile_co=None,
              compute_dtype=jnp.bfloat16,
              vmem_budget_bytes=24 * 1024 * 1024,
              vmem_limit_bytes=48 * 1024 * 1024):
    """ReluConv forward. x_nchw: (N, Cin, H, W) f32 -> (N, Cout, H, W) f32."""
    assert stride == 1, "kernel implements the module defaults (stride=1)"
    N, Cin, H, W = x_nchw.shape
    Cout, Cin_w, Kh, Kw = weight_oihw.shape
    assert Cin_w == Cin and Kh == k and Kw == k
    assert pad == k // 2, "kernel assumes 'same' padding (p = k // 2)"
    Hp, Wp = H + 2 * pad, W + 2 * pad

    # ---- BatchNorm folding (inference form): scale into weights, bias kept ----
    # TODO(synk): training-mode BatchNorm (batch statistics) not implemented.
    inv_std = lax.rsqrt(running_var + eps)
    scale = gamma * inv_std                                        # (Cout,)
    bias = (beta - running_mean * scale).reshape(1, Cout).astype(jnp.float32)

    # OIHW -> (K*K, Cin, Cout) with BN scale folded into the O axis, bf16 operand.
    w = weight_oihw * scale[:, None, None, None]
    w = jnp.transpose(w, (2, 3, 1, 0)).reshape(k * k, Cin, Cout).astype(compute_dtype)

    # NCHW -> NHWC, spatial zero-pad, cast to bf16 (fused by XLA under jit).
    # TODO(synk): an NHWC end-to-end model would remove these transposes.
    x = jnp.transpose(x_nchw, (0, 2, 3, 1)).astype(compute_dtype)
    xp = jnp.pad(x, ((0, 0), (pad, pad), (pad, pad), (0, 0)))

    # ---- tile selection (sized for v7x's 64 MiB VMEM: ~24 MiB working set) ----
    if tile_co is None:
        tile_co = 256 if (Cout > 256 and Cout % 256 == 0) else Cout
    assert Cout % tile_co == 0 and (tile_co % 128 == 0 or tile_co == Cout)

    itemsize = jnp.dtype(compute_dtype).itemsize
    in_img_bytes = Hp * Wp * Cin * itemsize
    w_bytes = k * k * Cin * tile_co * itemsize
    fixed = 2 * in_img_bytes + 2 * w_bytes + (1 << 20)   # dbl-buffered input + w + slack
    per_row = W * tile_co * 4 * 3                        # 2 output buffers + acc (f32)
    if tile_h is None:
        tile_h = _largest_tile_h(H, W, (vmem_budget_bytes - fixed) // per_row)
    assert H % tile_h == 0 and ((tile_h * W) % 8 == 0 or tile_h == H)

    n_h = H // tile_h
    n_co = Cout // tile_co
    grid = (N, n_co, n_h)

    out_flat = pl.pallas_call(
        _make_relu_conv_kernel(k, tile_h, W),
        out_shape=jax.ShapeDtypeStruct((N, H * W, Cout), jnp.float32),
        grid=grid,
        in_specs=[
            # full padded image of batch element n; block index depends only on
            # n, so it is fetched once per image and reused across (co, h).
            pl.BlockSpec((1, Hp, Wp, Cin), lambda n, co, h: (n, 0, 0, 0)),
            pl.BlockSpec((k * k, Cin, tile_co), lambda n, co, h: (0, 0, co)),
            pl.BlockSpec((1, tile_co), lambda n, co, h: (0, co)),
        ],
        out_specs=pl.BlockSpec((1, tile_h * W, tile_co), lambda n, co, h: (n, h, co)),
        compiler_params=pltpu.CompilerParams(
            dimension_semantics=("parallel", "parallel", "parallel"),
            vmem_limit_bytes=vmem_limit_bytes),
    )(xp, w, bias)

    out_nhwc = out_flat.reshape(N, H, W, Cout)          # free metadata reshape
    return jnp.transpose(out_nhwc, (0, 3, 1, 2))        # back to NCHW


def _reference(x_nchw, weight_oihw, gamma, beta, running_mean, running_var,
               *, pad=1, eps=1e-5):
    y = lax.conv_general_dilated(
        x_nchw, weight_oihw, window_strides=(1, 1),
        padding=((pad, pad), (pad, pad)),
        dimension_numbers=("NCHW", "OIHW", "NCHW"))
    scale = (gamma / jnp.sqrt(running_var + eps)).reshape(1, -1, 1, 1)
    bias = (beta - running_mean * gamma / jnp.sqrt(running_var + eps)).reshape(1, -1, 1, 1)
    return jnp.maximum(y * scale + bias, 0.0)


if __name__ == "__main__":
    key = jax.random.PRNGKey(0)
    N, Cin, Cout, H, W, K = 2, 4, 8, 16, 16, 3

    k0, k1, k2, k3, k4, k5 = jax.random.split(key, 6)
    x = jax.random.normal(k0, (N, Cin, H, W), jnp.float32)
    weight = jax.random.normal(k1, (Cout, Cin, K, K), jnp.float32) * 0.1
    gamma = 1.0 + 0.1 * jax.random.normal(k2, (Cout,), jnp.float32)
    beta = 0.1 * jax.random.normal(k3, (Cout,), jnp.float32)
    running_mean = 0.1 * jax.random.normal(k4, (Cout,), jnp.float32)
    running_var = jnp.abs(1.0 + 0.1 * jax.random.normal(k5, (Cout,), jnp.float32))

    ref = _reference(x, weight, gamma, beta, running_mean, running_var, pad=1)

    # explicit 2-tile grid along H, plus the auto-tiled path
    fn_tiled = jax.jit(functools.partial(relu_conv, k=K, stride=1, pad=1, tile_h=8))
    fn_auto = jax.jit(functools.partial(relu_conv, k=K, stride=1, pad=1))

    out = jax.block_until_ready(
        fn_tiled(x, weight, gamma, beta, running_mean, running_var))
    out_auto = jax.block_until_ready(
        fn_auto(x, weight, gamma, beta, running_mean, running_var))

    assert out.shape == (N, Cout, H, W)
    # bf16 MXU operands -> compare against the f32 reference at bf16 tolerance.
    assert jnp.allclose(out, ref, atol=5e-2, rtol=5e-2), \
        float(jnp.max(jnp.abs(out - ref)))
    assert jnp.allclose(out_auto, ref, atol=5e-2, rtol=5e-2)

    print("KERNEL_OK")
</pallas_src>

<mosaic_0001>
module attributes {stable_mosaic.version = 11 : i64} {
  func.func @kernel(%arg0: i32, %arg1: i32, %arg2: i32, %arg3: memref<1x18x18x4xbf16, #tpu.memory_space<vmem>>, %arg4: memref<9x4x8xbf16, #tpu.memory_space<vmem>>, %arg5: memref<1x8xf32, #tpu.memory_space<vmem>>, %arg6: memref<1x128x8xf32, #tpu.memory_space<vmem>>) attributes {dimension_semantics = [#tpu.dimension_semantics<parallel>, #tpu.dimension_semantics<parallel>, #tpu.dimension_semantics<parallel>], iteration_bounds = array<i64: 2, 1, 2>, scalar_prefetch = 0 : i64, scratch_operands = 0 : i64, tpu.core_type = #tpu.core_type<tc>, window_params = [{transform_indices = @transform_0, window_bounds = array<i64: 1, 18, 18, 4>}, {transform_indices = @transform_1, window_bounds = array<i64: 9, 4, 8>}, {transform_indices = @transform_2, window_bounds = array<i64: 1, 8>}, {transform_indices = @transform_3, window_bounds = array<i64: 1, 128, 8>}]} {
    %c8_i32 = arith.constant 8 : i32
    %0 = arith.muli %arg2, %c8_i32 : i32
    %1 = tpu.assume_multiple %0, 8 : i32
    %cst = arith.constant 0.000000e+00 : f32
    %2 = vector.broadcast %cst : f32 to vector<128x8xf32>
    %c0_i32 = arith.constant 0 : i32
    %3 = arith.addi %1, %c0_i32 : i32
    %c0 = arith.constant 0 : index
    %4 = arith.index_cast %3 : i32 to index
    %c0_0 = arith.constant 0 : index
    %c0_1 = arith.constant 0 : index
    %5 = vector.load %arg3[%c0, %4, %c0_0, %c0_1] : memref<1x18x18x4xbf16, #tpu.memory_space<vmem>>, vector<1x8x16x4xbf16>
    %6 = vector.shape_cast %5 : vector<1x8x16x4xbf16> to vector<8x16x4xbf16>
    %7 = vector.shape_cast %6 : vector<8x16x4xbf16> to vector<128x4xbf16>
    %c0_2 = arith.constant 0 : index
    %c0_3 = arith.constant 0 : index
    %c0_4 = arith.constant 0 : index
    %8 = vector.load %arg4[%c0_2, %c0_3, %c0_4] : memref<9x4x8xbf16, #tpu.memory_space<vmem>>, vector<1x4x8xbf16>
    %9 = vector.shape_cast %8 : vector<1x4x8xbf16> to vector<4x8xbf16>
    %cst_5 = arith.constant dense<0.000000e+00> : vector<128x8xf32>
    %10 = tpu.matmul %7, %9, %cst_5 {dimension_numbers = #tpu.dot_dimension_numbers<[1], [0], [0], [1], [0, 0, 1, 1], [], []>} : vector<128x4xbf16>, vector<4x8xbf16>, vector<128x8xf32> -> vector<128x8xf32>
    %11 = arith.addf %2, %10 : vector<128x8xf32>
    %c0_i32_6 = arith.constant 0 : i32
    %12 = arith.addi %1, %c0_i32_6 : i32
    %c0_7 = arith.constant 0 : index
    %13 = arith.index_cast %12 : i32 to index
    %c1 = arith.constant 1 : index
    %c0_8 = arith.constant 0 : index
    %14 = vector.load %arg3[%c0_7, %13, %c1, %c0_8] : memref<1x18x18x4xbf16, #tpu.memory_space<vmem>>, vector<1x8x16x4xbf16>
    %15 = vector.shape_cast %14 : vector<1x8x16x4xbf16> to vector<8x16x4xbf16>
    %16 = vector.shape_cast %15 : vector<8x16x4xbf16> to vector<128x4xbf16>
    %c1_9 = arith.constant 1 : index
    %c0_10 = arith.constant 0 : index
    %c0_11 = arith.constant 0 : index
    %17 = vector.load %arg4[%c1_9, %c0_10, %c0_11] : memref<9x4x8xbf16, #tpu.memory_space<vmem>>, vector<1x4x8xbf16>
    %18 = vector.shape_cast %17 : vector<1x4x8xbf16> to vector<4x8xbf16>
    %cst_12 = arith.constant dense<0.000000e+00> : vector<128x8xf32>
    %19 = tpu.matmul %16, %18, %cst_12 {dimension_numbers = #tpu.dot_dimension_numbers<[1], [0], [0], [1], [0, 0, 1, 1], [], []>} : vector<128x4xbf16>, vector<4x8xbf16>, vector<128x8xf32> -> vector<128x8xf32>
    %20 = arith.addf %11, %19 : vector<128x8xf32>
    %c0_i32_13 = arith.constant 0 : i32
    %21 = arith.addi %1, %c0_i32_13 : i32
    %c0_14 = arith.constant 0 : index
    %22 = arith.index_cast %21 : i32 to index
    %c2 = arith.constant 2 : index
    %c0_15 = arith.constant 0 : index
    %23 = vector.load %arg3[%c0_14, %22, %c2, %c0_15] : memref<1x18x18x4xbf16, #tpu.memory_space<vmem>>, vector<1x8x16x4xbf16>
    %24 = vector.shape_cast %23 : vector<1x8x16x4xbf16> to vector<8x16x4xbf16>
    %25 = vector.shape_cast %24 : vector<8x16x4xbf16> to vector<128x4xbf16>
    %c2_16 = arith.constant 2 : index
    %c0_17 = arith.constant 0 : index
    %c0_18 = arith.constant 0 : index
    %26 = vector.load %arg4[%c2_16, %c0_17, %c0_18] : memref<9x4x8xbf16, #tpu.memory_space<vmem>>, vector<1x4x8xbf16>
    %27 = vector.shape_cast %26 : vector<1x4x8xbf16> to vector<4x8xbf16>
    %cst_19 = arith.constant dense<0.000000e+00> : vector<128x8xf32>
    %28 = tpu.matmul %25, %27, %cst_19 {dimension_numbers = #tpu.dot_dimension_numbers<[1], [0], [0], [1], [0, 0, 1, 1], [], []>} : vector<128x4xbf16>, vector<4x8xbf16>, vector<128x8xf32> -> vector<128x8xf32>
    %29 = arith.addf %20, %28 : vector<128x8xf32>
    %c1_i32 = arith.constant 1 : i32
    %30 = arith.addi %1, %c1_i32 : i32
    %c0_20 = arith.constant 0 : index
    %31 = arith.index_cast %30 : i32 to index
    %c0_21 = arith.constant 0 : index
    %c0_22 = arith.constant 0 : index
    %32 = vector.load %arg3[%c0_20, %31, %c0_21, %c0_22] : memref<1x18x18x4xbf16, #tpu.memory_space<vmem>>, vector<1x8x16x4xbf16>
    %33 = vector.shape_cast %32 : vector<1x8x16x4xbf16> to vector<8x16x4xbf16>
    %34 = vector.shape_cast %33 : vector<8x16x4xbf16> to vector<128x4xbf16>
    %c3 = arith.constant 3 : index
    %c0_23 = arith.constant 0 : index
    %c0_24 = arith.constant 0 : index
    %35 = vector.load %arg4[%c3, %c0_23, %c0_24] : memref<9x4x8xbf16, #tpu.memory_space<vmem>>, vector<1x4x8xbf16>
    %36 = vector.shape_cast %35 : vector<1x4x8xbf16> to vector<4x8xbf16>
    %cst_25 = arith.constant dense<0.000000e+00> : vector<128x8xf32>
    %37 = tpu.matmul %34, %36, %cst_25 {dimension_numbers = #tpu.dot_dimension_numbers<[1], [0], [0], [1], [0, 0, 1, 1], [], []>} : vector<128x4xbf16>, vector<4x8xbf16>, vector<128x8xf32> -> vector<128x8xf32>
    %38 = arith.addf %29, %37 : vector<128x8xf32>
    %c1_i32_26 = arith.constant 1 : i32
    %39 = arith.addi %1, %c1_i32_26 : i32
    %c0_27 = arith.constant 0 : index
    %40 = arith.index_cast %39 : i32 to index
    %c1_28 = arith.constant 1 : index
    %c0_29 = arith.constant 0 : index
    %41 = vector.load %arg3[%c0_27, %40, %c1_28, %c0_29] : memref<1x18x18x4xbf16, #tpu.memory_space<vmem>>, vector<1x8x16x4xbf16>
    %42 = vector.shape_cast %41 : vector<1x8x16x4xbf16> to vector<8x16x4xbf16>
    %43 = vector.shape_cast %42 : vector<8x16x4xbf16> to vector<128x4xbf16>
    %c4 = arith.constant 4 : index
    %c0_30 = arith.constant 0 : index
    %c0_31 = arith.constant 0 : index
    %44 = vector.load %arg4[%c4, %c0_30, %c0_31] : memref<9x4x8xbf16, #tpu.memory_space<vmem>>, vector<1x4x8xbf16>
    %45 = vector.shape_cast %44 : vector<1x4x8xbf16> to vector<4x8xbf16>
    %cst_32 = arith.constant dense<0.000000e+00> : vector<128x8xf32>
    %46 = tpu.matmul %43, %45, %cst_32 {dimension_numbers = #tpu.dot_dimension_numbers<[1], [0], [0], [1], [0, 0, 1, 1], [], []>} : vector<128x4xbf16>, vector<4x8xbf16>, vector<128x8xf32> -> vector<128x8xf32>
    %47 = arith.addf %38, %46 : vector<128x8xf32>
    %c1_i32_33 = arith.constant 1 : i32
    %48 = arith.addi %1, %c1_i32_33 : i32
    %c0_34 = arith.constant 0 : index
    %49 = arith.index_cast %48 : i32 to index
    %c2_35 = arith.constant 2 : index
    %c0_36 = arith.constant 0 : index
    %50 = vector.load %arg3[%c0_34, %49, %c2_35, %c0_36] : memref<1x18x18x4xbf16, #tpu.memory_space<vmem>>, vector<1x8x16x4xbf16>
    %51 = vector.shape_cast %50 : vector<1x8x16x4xbf16> to vector<8x16x4xbf16>
    %52 = vector.shape_cast %51 : vector<8x16x4xbf16> to vector<128x4xbf16>
    %c5 = arith.constant 5 : index
    %c0_37 = arith.constant 0 : index
    %c0_38 = arith.constant 0 : index
    %53 = vector.load %arg4[%c5, %c0_37, %c0_38] : memref<9x4x8xbf16, #tpu.memory_space<vmem>>, vector<1x4x8xbf16>
    %54 = vector.shape_cast %53 : vector<1x4x8xbf16> to vector<4x8xbf16>
    %cst_39 = arith.constant dense<0.000000e+00> : vector<128x8xf32>
    %55 = tpu.matmul %52, %54, %cst_39 {dimension_numbers = #tpu.dot_dimension_numbers<[1], [0], [0], [1], [0, 0, 1, 1], [], []>} : vector<128x4xbf16>, vector<4x8xbf16>, vector<128x8xf32> -> vector<128x8xf32>
    %56 = arith.addf %47, %55 : vector<128x8xf32>
    %c2_i32 = arith.constant 2 : i32
    %57 = arith.addi %1, %c2_i32 : i32
    %c0_40 = arith.constant 0 : index
    %58 = arith.index_cast %57 : i32 to index
    %c0_41 = arith.constant 0 : index
    %c0_42 = arith.constant 0 : index
    %59 = vector.load %arg3[%c0_40, %58, %c0_41, %c0_42] : memref<1x18x18x4xbf16, #tpu.memory_space<vmem>>, vector<1x8x16x4xbf16>
    %60 = vector.shape_cast %59 : vector<1x8x16x4xbf16> to vector<8x16x4xbf16>
    %61 = vector.shape_cast %60 : vector<8x16x4xbf16> to vector<128x4xbf16>
    %c6 = arith.constant 6 : index
    %c0_43 = arith.constant 0 : index
    %c0_44 = arith.constant 0 : index
    %62 = vector.load %arg4[%c6, %c0_43, %c0_44] : memref<9x4x8xbf16, #tpu.memory_space<vmem>>, vector<1x4x8xbf16>
    %63 = vector.shape_cast %62 : vector<1x4x8xbf16> to vector<4x8xbf16>
    %cst_45 = arith.constant dense<0.000000e+00> : vector<128x8xf32>
    %64 = tpu.matmul %61, %63, %cst_45 {dimension_numbers = #tpu.dot_dimension_numbers<[1], [0], [0], [1], [0, 0, 1, 1], [], []>} : vector<128x4xbf16>, vector<4x8xbf16>, vector<128x8xf32> -> vector<128x8xf32>
    %65 = arith.addf %56, %64 : vector<128x8xf32>
    %c2_i32_46 = arith.constant 2 : i32
    %66 = arith.addi %1, %c2_i32_46 : i32
    %c0_47 = arith.constant 0 : index
    %67 = arith.index_cast %66 : i32 to index
    %c1_48 = arith.constant 1 : index
    %c0_49 = arith.constant 0 : index
    %68 = vector.load %arg3[%c0_47, %67, %c1_48, %c0_49] : memref<1x18x18x4xbf16, #tpu.memory_space<vmem>>, vector<1x8x16x4xbf16>
    %69 = vector.shape_cast %68 : vector<1x8x16x4xbf16> to vector<8x16x4xbf16>
    %70 = vector.shape_cast %69 : vector<8x16x4xbf16> to vector<128x4xbf16>
    %c7 = arith.constant 7 : index
    %c0_50 = arith.constant 0 : index
    %c0_51 = arith.constant 0 : index
    %71 = vector.load %arg4[%c7, %c0_50, %c0_51] : memref<9x4x8xbf16, #tpu.memory_space<vmem>>, vector<1x4x8xbf16>
    %72 = vector.shape_cast %71 : vector<1x4x8xbf16> to vector<4x8xbf16>
    %cst_52 = arith.constant dense<0.000000e+00> : vector<128x8xf32>
    %73 = tpu.matmul %70, %72, %cst_52 {dimension_numbers = #tpu.dot_dimension_numbers<[1], [0], [0], [1], [0, 0, 1, 1], [], []>} : vector<128x4xbf16>, vector<4x8xbf16>, vector<128x8xf32> -> vector<128x8xf32>
    %74 = arith.addf %65, %73 : vector<128x8xf32>
    %c2_i32_53 = arith.constant 2 : i32
    %75 = arith.addi %1, %c2_i32_53 : i32
    %c0_54 = arith.constant 0 : index
    %76 = arith.index_cast %75 : i32 to index
    %c2_55 = arith.constant 2 : index
    %c0_56 = arith.constant 0 : index
    %77 = vector.load %arg3[%c0_54, %76, %c2_55, %c0_56] : memref<1x18x18x4xbf16, #tpu.memory_space<vmem>>, vector<1x8x16x4xbf16>
    %78 = vector.shape_cast %77 : vector<1x8x16x4xbf16> to vector<8x16x4xbf16>
    %79 = vector.shape_cast %78 : vector<8x16x4xbf16> to vector<128x4xbf16>
    %c8 = arith.constant 8 : index
    %c0_57 = arith.constant 0 : index
    %c0_58 = arith.constant 0 : index
    %80 = vector.load %arg4[%c8, %c0_57, %c0_58] : memref<9x4x8xbf16, #tpu.memory_space<vmem>>, vector<1x4x8xbf16>
    %81 = vector.shape_cast %80 : vector<1x4x8xbf16> to vector<4x8xbf16>
    %cst_59 = arith.constant dense<0.000000e+00> : vector<128x8xf32>
    %82 = tpu.matmul %79, %81, %cst_59 {dimension_numbers = #tpu.dot_dimension_numbers<[1], [0], [0], [1], [0, 0, 1, 1], [], []>} : vector<128x4xbf16>, vector<4x8xbf16>, vector<128x8xf32> -> vector<128x8xf32>
    %83 = arith.addf %74, %82 : vector<128x8xf32>
    %c0_60 = arith.constant 0 : index
    %c0_61 = arith.constant 0 : index
    %84 = vector.load %arg5[%c0_60, %c0_61] : memref<1x8xf32, #tpu.memory_space<vmem>>, vector<1x8xf32>
    %85 = vector.broadcast %84 : vector<1x8xf32> to vector<128x8xf32>
    %86 = arith.addf %83, %85 : vector<128x8xf32>
    %cst_62 = arith.constant 0.000000e+00 : f32
    %87 = vector.broadcast %cst_62 : f32 to vector<128x8xf32>
    %88 = arith.maximumf %86, %87 : vector<128x8xf32>
    %c0_63 = arith.constant 0 : index
    %c0_64 = arith.constant 0 : index
    %c0_65 = arith.constant 0 : index
    %89 = vector.load %arg6[%c0_63, %c0_64, %c0_65] : memref<1x128x8xf32, #tpu.memory_space<vmem>>, vector<1x128x8xf32>
    %90 = vector.shape_cast %89 : vector<1x128x8xf32> to vector<128x8xf32>
    %91 = vector.shape_cast %88 : vector<128x8xf32> to vector<1x128x8xf32>
    tpu.vector_store %arg6[%c0_63, %c0_64, %c0_65], %91 {strides = array<i32>} : memref<1x128x8xf32, #tpu.memory_space<vmem>>, vector<1x128x8xf32>,
    return
  }
  func.func @transform_0(%arg0: i32, %arg1: i32, %arg2: i32) -> (i32, i32, i32, i32) {
    %c0_i32 = arith.constant 0 : i32
    %c0_i32_0 = arith.constant 0 : i32
    %c0_i32_1 = arith.constant 0 : i32
    %c0_i32_2 = arith.constant 0 : i32
    return %arg0, %c0_i32, %c0_i32_0, %c0_i32_1 : i32, i32, i32, i32
  }
  func.func @transform_1(%arg0: i32, %arg1: i32, %arg2: i32) -> (i32, i32, i32) {
    %c0_i32 = arith.constant 0 : i32
    %c0_i32_0 = arith.constant 0 : i32
    %c0_i32_1 = arith.constant 0 : i32
    return %c0_i32, %c0_i32_0, %arg1 : i32, i32, i32
  }
  func.func @transform_2(%arg0: i32, %arg1: i32, %arg2: i32) -> (i32, i32) {
    %c0_i32 = arith.constant 0 : i32
    %c0_i32_0 = arith.constant 0 : i32
    return %c0_i32, %arg1 : i32, i32
  }
  func.func @transform_3(%arg0: i32, %arg1: i32, %arg2: i32) -> (i32, i32, i32) {
    %c0_i32 = arith.constant 0 : i32
    return %arg0, %arg2, %arg1 : i32, i32, i32
  }
}

</mosaic_0001>

<bundles_post_ra>
// kernel: relu_conv.1
= control target key start
LH: loop header
LB: loop body
LE: loop exit
PB: predicated region body
PF: predicated region fallthrough
CT: control target
= control target key end

     0   :  { %s3699_s12 = smov 0   ;;  %s3701_s13 = smov 0   ;;  %s4670_s0 = inlined_call_operand.vmem [shape: bf16[2,18,18,4], index: 0, kind: input, shape index: {}]   ;;  %s4671_s1 = inlined_call_operand.vmem [shape: bf16[9,4,8], index: 1, kind: input, shape index: {}]   ;;  %s4672_s2 = inlined_call_operand.vmem [shape: f32[1,8], index: 2, kind: input, shape index: {}]   ;;  %s4673_s3 = inlined_call_operand.vmem [shape: f32[2,256,8], index: 3, kind: output, shape index: {}]  }
   0x1   :  { %s3703_s14 = smov 0   ;;  %s3705_s15 = smov 0  }
   0x2   :  { %s3707_s16 = smov 0  }
   0x3 LB: > { %s25_s17 = sadd.s32 1, %s3669_s14  ;;  %s32_s18 = sadd.s32 1, %s3673_s15  ;;  %s3677_s16 = sphi %s3707_s16, %s13_s16   ;;  %s3673_s15 = sphi %s3705_s15, %s4699_s15   ;;  %s3669_s14 = sphi %s3703_s14, %s4698_s14   ;;  %s3665_s13 = sphi %s3701_s13, %s4697_s13   ;;  %s3661_s12 = sphi %s3699_s12, %s4696_s12  }
   0x4   : > { %p26_p0 = scmp.ge.s32.totalorder %s25_s17, 2  ;;  %p2902_p1 = scmp.ge.s32.totalorder %s3677_s16, 1 }
   0x5   : > { %p177_p2 = scmp.lt.s32.totalorder %s3677_s16, 5 }
   0x6   : > { %s4701_s17 = smov (%p26_p0, %s25_s17), 0  ;;  %s4703_s18 = smov (!%p26_p0, %s32_s18), %s3673_s15 }
   0x7   : > { %p178_p3 = pnand %p2902_p1, %p177_p2  ;;  %p34_p4 = scmp.ge.s32.totalorder %s4703_s18, 2 }
   0x9   : > { %s4705_s18 = smov (%p34_p4, %s4703_s18), 0  ;;  %181 = sbr.rel (%p178_p3) target bundleno = 421 (0x1a5), region = 32 }
  0x10   : > { %v2910_v0 = vld [vmem:[%s4671_s1 + $0x2] sm:$0x3]  ;;  %vm516_vm0 = vcmask 1041408   ;;  %v3027_v1 = vld [vmem:[%s4671_s1 + $0x8] sm:$0x3]  ;;  %p215_p5 = scmp.lt.s32.totalorder %s3665_s13, 1 }
  0x11   : > { %3563 = vmatprep.subr.msk.bf16.mxu1 %vm516_vm0, %v2910_v0  ;;  %3567 = vmatprep.subr.msk.bf16.mxu0 %vm516_vm0, %v3027_v1  ;;  %v518_v2 = vsel %vm516_vm0, %v2910_v0, 0  ;;  %v3741_v3 = vsel %vm516_vm0, %v3027_v1, 0  ;;  %v261_v4 = vld [vmem:[%s4671_s1] sm:$0x3]  ;;  %s3189_s25 = smul.u32 96, %s3661_s12  ;;  %vm491_vm3 = vcmask 31744  }
  0x12   : > { %3272 = vmatpush3.bf16.msra.mxu1 %v518_v2  ;;  %3344 = vmatpush3.bf16.msra.mxu0 %v3741_v3  ;;  %s4707_s13 = smov (!%p215_p5, %s3665_s13), 1  ;;  %v3060_v5 = vld [vmem:[%s4671_s1 + $0xa] sm:$0x3]  ;;  %vm270_vm1 = vsmask.f32 3328  ;;  %v3783_v17 = vsel %vm516_vm0, %v261_v4, 0 }
  0x13   : > { %3564 = vmatprep.subr.msk.bf16.mxu1 %vm516_vm0, %v261_v4  ;;  %s3573_s28 = smul.u32 216, %s4707_s13  ;;  %3569 = vmatprep.subr.msk.bf16.mxu0 %vm516_vm0, %v3060_v5  ;;  %vm271_vm2 = vsmask.f32 7440  ;;  %v3789_v26 = vld [vmem:[%s4671_s1 + $0xc] sm:$0x3]  ;;  %v3806_v37 = vsel %vm516_vm0, %v3060_v5, 0 }
  0x14   : > { %vm3798_vm4 = vmor %vm270_vm1, %vm271_vm2  ;;  %v3810_v41 = vsel %vm516_vm0, %v3789_v26, 0  ;;  %vm805_vm5 = vcmask 1042432   ;;  %vm806_vm6 = vcmask 1046532   ;;  %s2905_s26 = sshll.u32 %s4707_s13, 5  ;;  %vm2745_vm8 = vcmask 64512  }
  0x15   : > { %s219_s4 = scalar_lea.vmem %s4670_s0, %s3573_s28  ;;  %vm3953_vm7 = vmor %vm805_vm5, %vm806_vm6 }
  0x16   : > { %s3759_s5 = scalar_lea.vmem %s219_s4, %s3189_s25  ;;  %s2904_s25 = sshll.u32 %s3661_s12, 4 }
  0x17   : > { %v3762_v6 = vld [vmem:[%s3759_s5] sm:$0xf]  ;;  %v3765_v7 = vld [vmem:[%s3759_s5 + $0x4] sm:$0xf]  ;;  %v3768_v8 = vld [vmem:[%s3759_s5 + $0x8] sm:$0x1] }
  0x18   : > { %v274_v9 = vshrl.u32 %v3762_v6, 16  ;;  %v277_v10 = vshll.u32 %v3762_v6, 16  ;;  %v283_v11 = vshll.u32 %v3765_v7, 16  ;;  %v287_v12 = vshrl.u32 %v3765_v7, 16  ;;  %v3003_v13 = vld [vmem:[%s3759_s5 + $0xc] sm:$0xf] }
  0x19   : > { %v293_v14 = vshll.u32 %v3768_v8, 16  ;;  %v3777_v15 = vld [vmem:[%s3759_s5 + $0x10] sm:$0xf]  ;;  %v3780_v16 = vld [vmem:[%s3759_s5 + $0x14] sm:$0x1]  ;;  %v1257_v23 = vshrl.u32 %v3003_v13, 16 }
  0x1a   : > { %v276_v18 = vrot.slane %v274_v9, 4  ;;  %v279_v19 = vrot.slane %v277_v10, 5  ;;  %v285_v20 = vrot.slane %v283_v11, 5  ;;  %v289_v21 = vrot.slane %v287_v12, 4  ;;  %v3794_v31 = vld [vmem:[%s3759_s5 + $0xc] sm:$0xf] }
  0x1b   : > { %v295_v22 = vrot.slane %v293_v14, 5  ;;  %v1260_v24 = vshll.u32 %v3003_v13, 16  ;;  %v1266_v25 = vshll.u32 %v3777_v15, 16  ;;  %v1270_v29 = vshrl.u32 %v3777_v15, 16  ;;  %v3803_v36 = vld [vmem:[%s3759_s5 + $0x10] sm:$0xf] }
  0x1c   : > { %v280_v27 = vor.u32 %v279_v19, %v276_v18  ;;  %v290_v28 = vor.u32 %v289_v21, %v285_v20  ;;  %v1276_v30 = vshll.u32 %v3780_v16, 16  ;;  %v1259_v33 = vrot.slane %v1257_v23, 4  ;;  %v3813_v44 = vld [vmem:[%s3759_s5 + $0x14] sm:$0x1]  ;;  %v3006_v55 = vld [vmem:[%s3759_s5 + $0x18] sm:$0xf] }
  0x1d   : > { %v1262_v34 = vrot.slane %v1260_v24, 5  ;;  %v1268_v35 = vrot.slane %v1266_v25, 5  ;;  %v1272_v40 = vrot.slane %v1270_v29, 4  ;;  %v298_v45 = vshrl.u32 %v3794_v31, 16  ;;  %v3826_v60 = vld [vmem:[%s3759_s5 + $0x1c] sm:$0xf] }
  0x1e   : > { %v281_v38 = vrot.slane %v280_v27, 4  ;;  %v291_v39 = vrot.slane %v290_v28, 4  ;;  %v1278_v43 = vrot.slane %v1276_v30, 5  ;;  %v301_v46 = vshll.u32 %v3794_v31, 16  ;;  %v3834_v1 = vld [vmem:[%s3759_s5 + $0x20] sm:$0x1] }
  0x1f   : > { %v1263_v42 = vor.u32 %v1262_v34, %v1259_v33  ;;  %v1273_v49 = vor.u32 %v1272_v40, %v1268_v35  ;;  %v307_v50 = vshll.u32 %v3803_v36, 16  ;;  %v300_v53 = vrot.slane %v298_v45, 4  ;;  %v3842_v21 = vld [vmem:[%s3759_s5 + $0x18] sm:$0xf]  ;;  %v3849_v27 = vld [vmem:[%s3759_s5 + $0x1c] sm:$0xf] }
  0x20   : > { %v286_v47 = vsel %vm3798_vm4, %v281_v38, %v285_v20  ;;  %v296_v48 = vsel %vm3798_vm4, %v291_v39, %v295_v22  ;;  %v303_v54 = vrot.slane %v301_v46, 5  ;;  %v311_v58 = vshrl.u32 %v3803_v36, 16  ;;  %v3857_v38 = vld [vmem:[%s3759_s5 + $0x20] sm:$0x1]  ;;  %p230_p6 = scmp.lt.s32.totalorder %s2904_s25, 31 }
  0x21   : > { %v2911_v51 = vcombine.low %v286_v47, %v296_v48  ;;  %v1264_v52 = vrot.slane %v1263_v42, 4  ;;  %v1274_v56 = vrot.slane %v1273_v49, 4  ;;  %v309_v57 = vrot.slane %v307_v50, 5  ;;  %v3009_v47 = vld [vmem:[%s3759_s5 + $0x24] sm:$0xf] }
  0x22   : > { %v317_v59 = vshll.u32 %v3813_v44, 16  ;;  %v1648_v62 = vrot.slane %v3777_v15, 5  ;;  %v1651_v63 = vrot.slane %v3780_v16, 5  ;;  %v304_v0 = vor.u32 %v303_v54, %v300_v53  ;;  %s4709_s25 = smov (!%p230_p6, %s2904_s25), 31 }
  0x23   : > { %3273 = vmatprep.mubr.msk.bf16.mxu1 %vm491_vm3, %v2911_v51  ;;  %v1269_v61 = vsel %vm3798_vm4, %v1264_v52, %v1268_v35  ;;  %v1279_v2 = vsel %vm3798_vm4, %v1274_v56, %v1278_v43  ;;  %v313_v4 = vrot.slane %v311_v58, 4  ;;  %v1281_v9 = vshrl.u32 %v3006_v55, 16  ;;  %v3867_v52 = vld [vmem:[%s3759_s5 + $0x28] sm:$0xf]  ;;  %s236_s27 = sadd.s32 %s2905_s26, %s4709_s25 }
  0x24   : > { %v319_v5 = vrot.slane %v317_v59, 5  ;;  %v3028_v10 = vcombine.low %v1269_v61, %v1279_v2  ;;  %v305_v11 = vrot.slane %v304_v0, 4  ;;  %v1284_v12 = vshll.u32 %v3006_v55, 16  ;;  %v3879_v61 = vld [vmem:[%s3759_s5 + $0x2c] sm:$0x1]  ;;  %s2906_s30 = sshll.u32 %s236_s27, 3 }
  0x25   : > { %v1290_v13 = vshll.u32 %v3826_v60, 16  ;;  %v314_v14 = vor.u32 %v313_v4, %v309_v57  ;;  %v1283_v18 = vrot.slane %v1281_v9, 4  ;;  %v1294_v19 = vshrl.u32 %v3826_v60, 16  ;;  %s4606_s13 = scalar_lea.vmem %s4673_s3, %s2906_s30 }
  0x26   : > { %v1300_v20 = vshll.u32 %v3834_v1, 16  ;;  %3345 = vmatprep.mubr.msk.bf16.mxu0 %vm491_vm3, %v3028_v10  ;;  %v310_v22 = vsel %vm3798_vm4, %v305_v11, %v309_v57  ;;  %v1286_v23 = vrot.slane %v1284_v12, 5  ;;  %v1655_v25 = vrot.slane %v3826_v60, 5  ;;  %v3873_v57 = vld [vmem:[%s4671_s1 + $0x4] sm:$0x3] }
  0x27   : > { %v1292_v24 = vrot.slane %v1290_v13, 5  ;;  %v315_v28 = vrot.slane %v314_v14, 4  ;;  %v1296_v29 = vrot.slane %v1294_v19, 4  ;;  %v1658_v33 = vrot.slane %v3834_v1, 5  ;;  %v3886_v11 = vld [vmem:[%s3759_s5 + $0x24] sm:$0xf] }
  0x28   : > { %v1302_v30 = vrot.slane %v1300_v20, 5  ;;  %v1287_v34 = vor.u32 %v1286_v23, %v1283_v18  ;;  %v3854_v35 = vrot.slane %v1655_v25, 4  ;;  %v322_v39 = vshrl.u32 %v3842_v21, 16  ;;  %v3889_v19 = vld [vmem:[%s3759_s5 + $0x28] sm:$0xf] }
  0x29   : > { %v325_v40 = vshll.u32 %v3842_v21, 16  ;;  %v320_v42 = vsel %vm3798_vm4, %v315_v28, %v319_v5  ;;  %v1297_v43 = vor.u32 %v1296_v29, %v1292_v24  ;;  %v331_v45 = vshll.u32 %v3849_v27, 16  ;;  %v3899_v29 = vld [vmem:[%s3759_s5 + $0x2c] sm:$0x1] }
  0x2a   : > { %v335_v46 = vshrl.u32 %v3849_v27, 16  ;;  %v2912_v48 = vcombine.low %v310_v22, %v320_v42  ;;  %v1288_v49 = vrot.slane %v1287_v34, 4  ;;  %v324_v50 = vrot.slane %v322_v39, 4 }
  0x2b   : > { %v327_v51 = vrot.slane %v325_v40, 5  ;;  %v1298_v53 = vrot.slane %v1297_v43, 4  ;;  %v333_v54 = vrot.slane %v331_v45, 5  ;;  %v341_v56 = vshll.u32 %v3857_v38, 16  ;;  %v3012_v45 = vld [vmem:[%s3759_s5 + $0x30] sm:$0xf] }
  0x2c   : > { %v337_v55 = vrot.slane %v335_v46, 4  ;;  %3274 = vmatmul.mubr.msk.bf16.vlgmr.msra.gmra.mrb[0].mxu1 %vm491_vm3, %v2912_v48  ;;  %v1293_v58 = vsel %vm3798_vm4, %v1288_v49, %v1292_v24  ;;  %v1305_v0 = vshrl.u32 %v3009_v47, 16  ;;  %v1308_v2 = vshll.u32 %v3009_v47, 16 }
  0x2d   : > { %v328_v59 = vor.u32 %v327_v51, %v324_v50  ;;  %3290 = vmatpush3.bf16.msra.mxu1 %v3783_v17  ;;  %v1303_v4 = vsel %vm3798_vm4, %v1298_v53, %v1302_v30  ;;  %v343_v9 = vrot.slane %v341_v56, 5  ;;  %v1314_v10 = vshll.u32 %v3867_v52, 16  ;;  %v3909_v50 = vld [vmem:[%s3759_s5 + $0x34] sm:$0xf] }
  0x2e   : > { %v338_v5 = vor.u32 %v337_v55, %v333_v54  ;;  %v3029_v12 = vcombine.low %v1293_v58, %v1303_v4  ;;  %v1307_v14 = vrot.slane %v1305_v0, 4  ;;  %v1310_v18 = vrot.slane %v1308_v2, 5  ;;  %3565 = vmatprep.subr.msk.bf16.mxu1 %vm516_vm0, %v3873_v57  ;;  %v3919_v58 = vld [vmem:[%s3759_s5 + $0x38] sm:$0x1] }
  0x2f   : > { %v329_v13 = vrot.slane %v328_v59, 4  ;;  %v1316_v20 = vrot.slane %v1314_v10, 5  ;;  %v1318_v22 = vshrl.u32 %v3867_v52, 16  ;;  %v1324_v23 = vshll.u32 %v3879_v61, 16 }
  0x30   : > { %v339_v17 = vrot.slane %v338_v5, 4  ;;  %3346 = vmatmul.mubr.msk.bf16.vlgmr.msra.gmra.mrb[0].mxu0 %vm491_vm3, %v3029_v12  ;;  %v1311_v28 = vor.u32 %v1310_v18, %v1307_v14  ;;  %v346_v30 = vshrl.u32 %v3886_v11, 16  ;;  %v349_v34 = vshll.u32 %v3886_v11, 16  ;;  %v3924_v14 = vld [vmem:[%s3759_s5 + $0x30] sm:$0xf] }
  0x31   : > { %v334_v24 = vsel %vm3798_vm4, %v329_v13, %v333_v54  ;;  %3362 = vmatpush3.bf16.msra.mxu0 %v3806_v37  ;;  %v1320_v40 = vrot.slane %v1318_v22, 4  ;;  %v1326_v42 = vrot.slane %v1324_v23, 5  ;;  %v355_v43 = vshll.u32 %v3889_v19, 16  ;;  %v3930_v23 = vld [vmem:[%s3759_s5 + $0x34] sm:$0xf] }
  0x32   : > { %v344_v39 = vsel %vm3798_vm4, %v339_v17, %v343_v9  ;;  %v1312_v47 = vrot.slane %v1311_v28, 4  ;;  %v348_v48 = vrot.slane %v346_v30, 4  ;;  %v351_v49 = vrot.slane %v349_v34, 5  ;;  %3570 = vmatprep.subr.msk.bf16.mxu0 %vm516_vm0, %v3789_v26 }
  0x33   : > { %v2913_v46 = vcombine.low %v334_v24, %v344_v39  ;;  %v1321_v37 = vor.u32 %v1320_v40, %v1316_v20  ;;  %v357_v51 = vrot.slane %v355_v43, 5  ;;  %v359_v53 = vshrl.u32 %v3889_v19, 16  ;;  %v3935_v39 = vld [vmem:[%s3759_s5 + $0x38] sm:$0x1] }
  0x34   : > { %v365_v54 = vshll.u32 %v3899_v29, 16  ;;  %v1317_v55 = vsel %vm3798_vm4, %v1312_v47, %v1316_v20  ;;  %v352_v56 = vor.u32 %v351_v49, %v348_v48  ;;  %v1329_v59 = vshrl.u32 %v3012_v45, 16 }
  0x35   : > { %3277 = vmatprep.mubr.msk.bf16.mxu1 %vm491_vm3, %v2913_v46  ;;  %v1332_v0 = vshll.u32 %v3012_v45, 16  ;;  %v1322_v2 = vrot.slane %v1321_v37, 4  ;;  %v361_v26 = vrot.slane %v359_v53, 4  ;;  %v1338_v5 = vshll.u32 %v3909_v50, 16  ;;  %v3044_v37 = vld [vmem:[%s3759_s5 + $0xc] sm:$0xe] }
  0x36   : > { %v367_v4 = vrot.slane %v365_v54, 5  ;;  %v353_v9 = vrot.slane %v352_v56, 4  ;;  %v1331_v10 = vrot.slane %v1329_v59, 4  ;;  %v1342_v13 = vshrl.u32 %v3909_v50, 16  ;;  %v3947_v56 = vld [vmem:[%s3759_s5 + $0x3c] sm:$0xf] }
  0x37   : > { %v1334_v12 = vrot.slane %v1332_v0, 5  ;;  %v1327_v18 = vsel %vm3798_vm4, %v1322_v2, %v1326_v42  ;;  %v362_v17 = vor.u32 %v361_v26, %v357_v51  ;;  %v1340_v20 = vrot.slane %v1338_v5, 5 }
  0x38   : > { %v1348_v22 = vshll.u32 %v3919_v58, 16  ;;  %v3030_v24 = vcombine.low %v1317_v55, %v1327_v18  ;;  %v358_v28 = vsel %vm3798_vm4, %v353_v9, %v357_v51  ;;  %v1344_v34 = vrot.slane %v1342_v13, 4  ;;  %v3961_v18 = vld [vmem:[%s3759_s5 + $0x44] sm:$0x1] }
  0x39   : > { %v1335_v30 = vor.u32 %v1334_v12, %v1331_v10  ;;  %v363_v40 = vrot.slane %v362_v17, 4  ;;  %v370_v42 = vshrl.u32 %v3924_v14, 16  ;;  %v373_v45 = vshll.u32 %v3924_v14, 16  ;;  %v3045_v17 = vld [vmem:[%s3759_s5 + $0x18] sm:$0xe] }
  0x3a   : > { %v1350_v43 = vrot.slane %v1348_v22, 5  ;;  %3349 = vmatprep.mubr.msk.bf16.mxu0 %vm491_vm3, %v3030_v24  ;;  %v1345_v47 = vor.u32 %v1344_v34, %v1340_v20  ;;  %v379_v48 = vshll.u32 %v3930_v23, 16  ;;  %v383_v49 = vshrl.u32 %v3930_v23, 16 }
  0x3b   : > { %v1336_v46 = vrot.slane %v1335_v30, 4  ;;  %v368_v51 = vsel %vm3798_vm4, %v363_v40, %v367_v4  ;;  %v372_v53 = vrot.slane %v370_v42, 4  ;;  %v375_v54 = vrot.slane %v373_v45, 5  ;;  %v3958_v4 = vld [vmem:[%s3759_s5 + $0x40] sm:$0xf] }
  0x3c   : > { %v389_v55 = vshll.u32 %v3935_v39, 16  ;;  %v2914_v59 = vcombine.low %v358_v28, %v368_v51  ;;  %v1346_v2 = vrot.slane %v1345_v47, 4  ;;  %v381_v26 = vrot.slane %v379_v48, 5  ;;  %v3972_v30 = vld [vmem:[%s3759_s5 + $0x48] sm:$0xf] }
  0x3d   : > { %v1341_v0 = vsel %vm3798_vm4, %v1336_v46, %v1340_v20  ;;  %v376_v9 = vor.u32 %v375_v54, %v372_v53  ;;  %v385_v10 = vrot.slane %v383_v49, 4  ;;  %v3052_v13 = vrot.slane %v3044_v37, 9 }
  0x3e   : > { %v391_v12 = vrot.slane %v389_v55, 5  ;;  %3278 = vmatmul.mubr.msk.bf16.gmra.mrb[4].mxu1 %vm491_vm3, %v2914_v59  ;;  %v1351_v20 = vsel %vm3798_vm4, %v1346_v2, %v1350_v43  ;;  %v1650_v22 = vrot.slane %v1648_v62, 4  ;;  %v394_v24 = vshrl.u32 %v3947_v56, 16  ;;  %v3992_v55 = vld [vmem:[%s3759_s5 + $0x50] sm:$0x1] }
  0x3f   : > { %v397_v28 = vshll.u32 %v3947_v56, 16  ;;  %v3031_v34 = vcombine.low %v1341_v0, %v1351_v20  ;;  %v377_v40 = vrot.slane %v376_v9, 4  ;;  %v386_v42 = vor.u32 %v385_v10, %v381_v26 }
  0x40   : > { %v1649_v45 = vsel %vm3953_vm7, %v3052_v13, %v1648_v62  ;;  %v1652_v43 = vsel %vm3953_vm7, %v1650_v22, %v1651_v63  ;;  %v396_v46 = vrot.slane %v394_v24, 4  ;;  %v403_v48 = vshll.u32 %v3958_v4, 16  ;;  %v3988_v62 = vld [vmem:[%s3759_s5 + $0x4c] sm:$0xf] }
  0x41   : > { %v399_v47 = vrot.slane %v397_v28, 5  ;;  %3350 = vmatmul.mubr.msk.bf16.gmra.mrb[4].mxu0 %vm491_vm3, %v3031_v34  ;;  %v382_v49 = vsel %vm3798_vm4, %v377_v40, %v381_v26  ;;  %v387_v37 = vrot.slane %v386_v42, 4  ;;  %v3061_v15 = vcombine.low %v1649_v45, %v1652_v43  ;;  %v4010_v28 = vld [vmem:[%s3759_s5 + $0x54] sm:$0xf]  ;;  %v4021_v34 = vld [vmem:[%s4671_s1 + $0xe] sm:$0x3] }
  0x42   : > { %v407_v51 = vshrl.u32 %v3958_v4, 16  ;;  %v405_v53 = vrot.slane %v403_v48, 5  ;;  %v413_v63 = vshll.u32 %v3961_v18, 16  ;;  %v3053_v54 = vrot.slane %v3045_v17, 9 }
  0x43   : > { %v400_v16 = vor.u32 %v399_v47, %v396_v46  ;;  %v392_v59 = vsel %vm3798_vm4, %v387_v37, %v391_v12  ;;  %3363 = vmatprep.mubr.msk.bf16.mxu0 %vm491_vm3, %v3061_v15  ;;  %v1659_v2 = vsel %vm3953_vm7, %v3854_v35, %v1658_v33  ;;  %v418_v26 = vshrl.u32 %v3972_v30, 16  ;;  %v3046_v12 = vld [vmem:[%s3759_s5 + $0x24] sm:$0xe]  ;;  %v4026_v37 = vld [vmem:[%s3759_s5 + $0x58] sm:$0xf] }
  0x44   : > { %v409_v0 = vrot.slane %v407_v51, 4  ;;  %v2915_v9 = vcombine.low %v382_v49, %v392_v59  ;;  %v415_v13 = vrot.slane %v413_v63, 5  ;;  %v1656_v17 = vsel %vm3953_vm7, %v3053_v54, %v1655_v25  ;;  %v4035_v54 = vld [vmem:[%s3759_s5 + $0x5c] sm:$0x1] }
  0x45   : > { %v401_v10 = vrot.slane %v400_v16, 4  ;;  %v3062_v22 = vcombine.low %v1656_v17, %v1659_v2  ;;  %v420_v24 = vrot.slane %v418_v26, 4  ;;  %v421_v1 = vshll.u32 %v3972_v30, 16 }
  0x46   : > { %v410_v20 = vor.u32 %v409_v0, %v405_v53  ;;  %3281 = vmatprep.mubr.msk.bf16.mxu1 %vm491_vm3, %v2915_v9  ;;  %v427_v35 = vshll.u32 %v3988_v62, 16  ;;  %v431_v60 = vshrl.u32 %v3988_v62, 16  ;;  %v437_v25 = vshll.u32 %v3992_v55, 16 }
  0x47   : > { %v406_v33 = vsel %vm3798_vm4, %v401_v10, %v405_v53  ;;  %v423_v42 = vrot.slane %v421_v1, 5  ;;  %v3054_v45 = vrot.slane %v3046_v12, 9  ;;  %v1662_v43 = vrot.slane %v3867_v52, 5  ;;  %v3047_v10 = vld [vmem:[%s3759_s5 + $0x30] sm:$0xe] }
  0x48   : > { %v411_v40 = vrot.slane %v410_v20, 4  ;;  %v429_v46 = vrot.slane %v427_v35, 5  ;;  %v433_v47 = vrot.slane %v431_v60, 4  ;;  %v439_v48 = vrot.slane %v437_v25, 5 }
  0x49   : > { %v1665_v49 = vrot.slane %v3879_v61, 5  ;;  %3364 = vmatmul.mubr.msk.bf16.vlgmr.msra.gmra.mrb[0].mxu0 %vm491_vm3, %v3062_v22  ;;  %v424_v51 = vor.u32 %v423_v42, %v420_v24  ;;  %v1663_v16 = vsel %vm3953_vm7, %v3054_v45, %v1662_v43  ;;  %v1664_v53 = vrot.slane %v1662_v43, 4  ;;  %v4056_v42 = vld [vmem:[%s3759_s5 + $0x40] sm:$0xf]  ;;  %v4059_v45 = vld [vmem:[%s3759_s5 + $0x44] sm:$0x1] }
  0x4a   : > { %v416_v15 = vsel %vm3798_vm4, %v411_v40, %v415_v13  ;;  %3380 = vmatpush3.bf16.msra.mxu0 %v3810_v41  ;;  %v434_v52 = vor.u32 %v433_v47, %v429_v46  ;;  %v442_v61 = vshrl.u32 %v4010_v28, 16  ;;  %v445_v59 = vshll.u32 %v4010_v28, 16 }
  0x4b   : > { %v2916_v63 = vcombine.low %v406_v33, %v416_v15  ;;  %v425_v0 = vrot.slane %v424_v51, 4  ;;  %v1666_v2 = vsel %vm3953_vm7, %v1664_v53, %v1665_v49  ;;  %v451_v26 = vshll.u32 %v4026_v37, 16  ;;  %3571 = vmatprep.subr.msk.bf16.mxu0 %vm516_vm0, %v4021_v34  ;;  %v3048_v33 = vld [vmem:[%s3759_s5 + $0x3c] sm:$0xe] }
  0x4c   : > { %v455_v9 = vshrl.u32 %v4026_v37, 16  ;;  %v435_v41 = vrot.slane %v434_v52, 4  ;;  %v3063_v13 = vcombine.low %v1663_v16, %v1666_v2  ;;  %v444_v17 = vrot.slane %v442_v61, 4  ;;  %v3049_v2 = vld [vmem:[%s3759_s5 + $0x48] sm:$0xe] }
  0x4d   : > { %3282 = vmatmul.mubr.msk.bf16.gmra.mrb[8].mxu1 %vm491_vm3, %v2916_v63  ;;  %v447_v12 = vrot.slane %v445_v59, 5  ;;  %v430_v20 = vsel %vm3798_vm4, %v425_v0, %v429_v46  ;;  %v453_v22 = vrot.slane %v451_v26, 5  ;;  %v461_v1 = vshll.u32 %v4035_v54, 16  ;;  %v4074_v59 = vld [vmem:[%s3759_s5 + $0x4c] sm:$0xf] }
  0x4e   : > { %v457_v24 = vrot.slane %v455_v9, 4  ;;  %v440_v35 = vsel %vm3798_vm4, %v435_v41, %v439_v48  ;;  %3367 = vmatprep.mubr.msk.bf16.mxu0 %vm491_vm3, %v3063_v13  ;;  %v3055_v25 = vrot.slane %v3047_v10, 9  ;;  %v1669_v40 = vrot.slane %v3909_v50, 5  ;;  %v4077_v0 = vld [vmem:[%s3759_s5 + $0x50] sm:$0x1] }
  0x4f   : > { %v448_v60 = vor.u32 %v447_v12, %v444_v17  ;;  %v2917_v43 = vcombine.low %v430_v20, %v440_v35  ;;  %v463_v47 = vrot.slane %v461_v1, 5  ;;  %v1672_v49 = vrot.slane %v3919_v58, 5  ;;  %v4085_v17 = vld [vmem:[%s3759_s5 + $0x58] sm:$0xf]  ;;  %v4088_v12 = vld [vmem:[%s3759_s5 + $0x5c] sm:$0x1] }
  0x50   : > { %v458_v46 = vor.u32 %v457_v24, %v453_v22  ;;  %v1670_v48 = vsel %vm3953_vm7, %v3055_v25, %v1669_v40  ;;  %v1671_v51 = vrot.slane %v1669_v40, 4  ;;  %v3056_v16 = vrot.slane %v3048_v33, 9  ;;  %4683 = vst [vmem:[#allocation2_spill] sm:$0xff] %v4088_v12  ;;  %v4098_v35 = vld [vmem:[%s3759_s5 + $0x64] sm:$0xf] }
  0x51   : > { %v449_v15 = vrot.slane %v448_v60, 4  ;;  %3285 = vmatprep.mubr.msk.bf16.mxu1 %vm491_vm3, %v2917_v43  ;;  %v1676_v53 = vrot.slane %v4056_v42, 5  ;;  %v1679_v63 = vrot.slane %v4059_v45, 5  ;;  %v2927_v61 = vcombine.low %v3762_v6, %v3765_v7  ;;  %v3050_v6 = vld [vmem:[%s3759_s5 + $0x54] sm:$0xe]  ;;  %4684 = vst [vmem:[#allocation3_spill] sm:$0xff] %v4098_v35 }
  0x52   : > { %v459_v50 = vrot.slane %v458_v46, 4  ;;  %v1673_v58 = vsel %vm3953_vm7, %v1671_v51, %v1672_v49  ;;  %v1683_v24 = vrot.slane %v4074_v59, 5  ;;  %v1686_v1 = vrot.slane %v4077_v0, 5  ;;  %v4101_v60 = vld [vmem:[%s3759_s5 + $0x68] sm:$0x1] }
  0x53   : > { %v454_v52 = vsel %vm3798_vm4, %v449_v15, %v453_v22  ;;  %v3064_v9 = vcombine.low %v1670_v48, %v1673_v58  ;;  %v1677_v10 = vsel %vm3953_vm7, %v3056_v16, %v1676_v53  ;;  %v1678_v41 = vrot.slane %v1676_v53, 4  ;;  %4685 = vst [vmem:[#allocation4_spill] sm:$0xff] %v4101_v60 }
  0x54   : > { %v464_v26 = vsel %vm3798_vm4, %v459_v50, %v463_v47  ;;  %v3057_v22 = vrot.slane %v3049_v2, 9  ;;  %v1685_v40 = vrot.slane %v1683_v24, 4  ;;  %v3058_v43 = vrot.slane %v3050_v6, 9  ;;  %v3051_v47 = vld [vmem:[%s3759_s5 + $0x60] sm:$0xe] }
  0x55   : > { %v2918_v13 = vcombine.low %v454_v52, %v464_v26  ;;  %3368 = vmatmul.mubr.msk.bf16.gmra.mrb[4].mxu0 %vm491_vm3, %v3064_v9  ;;  %v1680_v20 = vsel %vm3953_vm7, %v1678_v41, %v1679_v63  ;;  %v1690_v46 = vrot.slane %v4085_v17, 5  ;;  %v817_v49 = vrot.slane %v3803_v36, 5  ;;  %v783_v2 = vld [vmem:[%s3759_s5 + $0x18] sm:$0xe]  ;;  %v4133_v6 = vld [vmem:[%s4671_s1 + $0x6] sm:$0x3] }
  0x56   : > { %v3065_v33 = vcombine.low %v1677_v10, %v1680_v20  ;;  %v1684_v25 = vsel %vm3953_vm7, %v3057_v22, %v1683_v24  ;;  %v1693_v15 = vrot.slane %v4088_v12, 5  ;;  %v1687_v48 = vsel %vm3953_vm7, %v1685_v40, %v1686_v1  ;;  %v785_v1 = vld [vmem:[%s3759_s5 + $0x30] sm:$0xe] }
  0x57   : > { %3286 = vmatmul.mubr.msk.bf16.gmra.mrb[12].mxu1 %vm491_vm3, %v2918_v13  ;;  %v1691_v51 = vsel %vm3953_vm7, %v3058_v43, %v1690_v46  ;;  %v1692_v16 = vrot.slane %v1690_v46, 4  ;;  %v1697_v50 = vrot.slane %v4098_v35, 5  ;;  %v2928_v53 = vcombine.low %v3794_v31, %v3803_v36  ;;  %v784_v36 = vld [vmem:[%s3759_s5 + $0x24] sm:$0xe]  ;;  %v4407_v12 = vld [vmem:[%s3759_s5 + $0x70] sm:$0xf] }
  0x58   : > { %3291 = vmatprep.mubr.msk.bf16.mxu1 %vm491_vm3, %v2927_v61  ;;  %3371 = vmatprep.mubr.msk.bf16.mxu0 %vm491_vm3, %v3065_v33  ;;  %v3066_v63 = vcombine.low %v1684_v25, %v1687_v48  ;;  %v3059_v52 = vrot.slane %v3051_v47, 9  ;;  %v1700_v58 = vrot.slane %v4101_v60, 5  ;;  %v782_v61 = vld [vmem:[%s3759_s5 + $0xc] sm:$0xe]  ;;  %v820_v26 = vrot.slane %v3813_v44, 5 }
  0x59   : > { %v2929_v9 = vcombine.low %v3842_v21, %v3849_v27  ;;  %v1694_v10 = vsel %vm3953_vm7, %v1692_v16, %v1693_v15  ;;  %v1699_v41 = vrot.slane %v1697_v50, 4  ;;  %v915_v13 = vsel %vm516_vm0, %v3873_v57, 0  ;;  %v3619_v16 = vld [vmem:[%s3759_s5 + $0x18] sm:$0xff]   ;;  %v4379_v60 = vld [vmem:[%s3759_s5 + $0x64] sm:$0xf] }
  0x5a   : > { %v3067_v31 = vcombine.low %v1691_v51, %v1694_v10  ;;  %v2944_v44 = vrot.slane %v782_v61, 9  ;;  %v819_v20 = vrot.slane %v817_v49, 4  ;;  %v2945_v21 = vrot.slane %v783_v2, 9  ;;  %4686 = vst [vmem:[#allocation5_spill] sm:$0xff] %v4379_v60 }
  0x5b   : > { %v1698_v22 = vsel %vm3953_vm7, %v3059_v52, %v1697_v50  ;;  %v1701_v57 = vsel %vm3953_vm7, %v1699_v41, %v1700_v58  ;;  %v824_v24 = vrot.slane %v3849_v27, 5  ;;  %v827_v40 = vrot.slane %v3857_v38, 5 }
  0x5c   : > { %v4146_v33 = vsel %vm3953_vm7, %v2944_v44, %v817_v49  ;;  %v4150_v25 = vsel %vm3953_vm7, %v819_v20, %v820_v26  ;;  %v2946_v43 = vrot.slane %v784_v36, 9  ;;  %v3068_v49 = vcombine.low %v1698_v22, %v1701_v57  ;;  %v3112_v26 = vld [vmem:[%s3759_s5 + $0x18] sm:$0xf]  ;;  %v3621_v57 = vld [vmem:[%s3759_s5 + $0x24] sm:$0xff]  }
  0x5d   : > { %3372 = vmatmul.mubr.msk.bf16.gmra.mrb[8].mxu0 %vm491_vm3, %v3066_v63  ;;  %v2953_v27 = vcombine.low %v4146_v33, %v4150_v25  ;;  %v4159_v46 = vsel %vm3953_vm7, %v2945_v21, %v824_v24  ;;  %v826_v47 = vrot.slane %v824_v24, 4  ;;  %v831_v15 = vrot.slane %v3889_v19, 5 }
  0x5e   : > { %3375 = vmatprep.mubr.msk.bf16.mxu0 %vm491_vm3, %v3067_v31  ;;  %v834_v48 = vrot.slane %v3899_v29, 5  ;;  %v2947_v38 = vrot.slane %v785_v1, 9  ;;  %v2930_v51 = vcombine.low %v3886_v11, %v3889_v19  ;;  %v841_v63 = vrot.slane %v3935_v39, 5  ;;  %v786_v19 = vld [vmem:[%s3759_s5 + $0x3c] sm:$0xe] }
  0x5f   : > { %3292 = vmatmul.mubr.msk.bf16.vlgmr.msra.gmra.mrb[0].mxu1 %vm491_vm3, %v2928_v53  ;;  %v4168_v50 = vsel %vm3953_vm7, %v826_v47, %v827_v40  ;;  %v838_v53 = vrot.slane %v3930_v23, 5  ;;  %v2931_v52 = vcombine.low %v3924_v14, %v3930_v23  ;;  %v4178_v58 = vsel %vm3953_vm7, %v2946_v43, %v831_v15  ;;  %v781_v14 = vld [vmem:[%s3759_s5] sm:$0xe]  ;;  %v4206_v31 = vld [vmem:[%s3759_s5 + $0x1c] sm:$0xf] }
  0x60   : > { %3308 = vmatpush3.bf16.msra.mxu1 %v915_v13  ;;  %3295 = vmatprep.mubr.msk.bf16.mxu1 %vm491_vm3, %v2929_v9  ;;  %v2954_v29 = vcombine.low %v4159_v46, %v4168_v50  ;;  %v833_v11 = vrot.slane %v831_v15, 4  ;;  %v810_v61 = vrot.slane %v3765_v7, 5  ;;  %v2948_v10 = vrot.slane %v786_v19, 9  ;;  %v787_v1 = vld [vmem:[%s3759_s5 + $0x48] sm:$0xe] }
  0x61   : > { %3566 = vmatprep.subr.msk.bf16.mxu1 %vm516_vm0, %v4133_v6  ;;  %v4184_v2 = vsel %vm3953_vm7, %v2947_v38, %v838_v53  ;;  %v840_v39 = vrot.slane %v838_v53, 4  ;;  %v813_v41 = vrot.slane %v3768_v8, 5  ;;  %v2943_v36 = vrot.slane %v781_v14, 9  ;;  %v4232_v38 = vld [vmem:[%s4671_s1 + $0x10] sm:$0x3] }
  0x62   : > { %v4190_v23 = vsel %vm3953_vm7, %v833_v11, %v834_v48  ;;  %v812_v44 = vrot.slane %v810_v61, 4  ;;  %v845_v20 = vrot.slane %v3958_v4, 5  ;;  %v848_v21 = vrot.slane %v3961_v18, 5  ;;  %v4253_v14 = vld [vmem:[%s3759_s5 + $0x28] sm:$0xf] }
  0x63   : > { %v4199_v9 = vsel %vm3953_vm7, %v840_v39, %v841_v63  ;;  %v2932_v22 = vcombine.low %v3947_v56, %v3958_v4  ;;  %v2095_v24 = vshrl.u32 %v3112_v26, 16  ;;  %v2098_v8 = vshll.u32 %v3112_v26, 16  ;;  %v3623_v4 = vld [vmem:[%s3759_s5 + $0x30] sm:$0xff]   ;;  %v4355_v46 = vld [vmem:[%s3759_s5 + $0x44] sm:$0x1] }
  0x64   : > { %v2104_v40 = vshll.u32 %v4206_v31, 16  ;;  %v2108_v43 = vshrl.u32 %v4206_v31, 16  ;;  %v4218_v47 = vsel %vm3953_vm7, %v2948_v10, %v845_v20  ;;  %v2337_v18 = vsel %vm516_vm0, %v4021_v34, 0  ;;  %v3130_v7 = vld [vmem:[%s3759_s5 + $0x60] sm:$0xf] }
  0x65   : > { %3376 = vmatmul.mubr.msk.bf16.gmra.mrb[12].mxu0 %vm491_vm3, %v3068_v49  ;;  %v847_v49 = vrot.slane %v845_v20, 4  ;;  %v2933_v56 = vcombine.low %v3972_v30, %v3988_v62  ;;  %v811_v15 = vsel %vm3953_vm7, %v2943_v36, %v810_v61  ;;  %v814_v48 = vsel %vm3953_vm7, %v812_v44, %v813_v41  ;;  %v4240_v30 = vld [vmem:[%s3759_s5 + $0x20] sm:$0x1]  ;;  %v3115_v61 = vld [vmem:[%s3759_s5 + $0x24] sm:$0xf] }
  0x66   : > { %3381 = vmatprep.mubr.msk.bf16.mxu0 %vm491_vm3, %v3619_v16  ;;  %v2949_v34 = vrot.slane %v787_v1, 9  ;;  %v2097_v16 = vrot.slane %v2095_v24, 4  ;;  %v2100_v53 = vrot.slane %v2098_v8, 5  ;;  %v4246_v11 = vrot.slane %v2104_v40, 5  ;;  %v788_v44 = vld [vmem:[%s3759_s5 + $0x54] sm:$0xe] }
  0x67   : > { %3296 = vmatmul.mubr.msk.bf16.gmra.mrb[4].mxu1 %vm491_vm3, %v2930_v51  ;;  %v4236_v51 = vsel %vm3953_vm7, %v847_v49, %v848_v21  ;;  %v2110_v19 = vrot.slane %v2108_v43, 4  ;;  %v855_v39 = vrot.slane %v3992_v55, 5  ;;  %v2934_v10 = vcombine.low %v4010_v28, %v4026_v37  ;;  %v3118_v55 = vld [vmem:[%s3759_s5 + $0x30] sm:$0xf]  ;;  %v3625_v20 = vld [vmem:[%s3759_s5 + $0x3c] sm:$0xff]   ;;  %v3626_v1 = vld [vmem:[%s3759_s5 + $0x48] sm:$0xff]  }
  0x68   : > { %3299 = vmatprep.mubr.msk.bf16.mxu1 %vm491_vm3, %v2931_v52  ;;  %v852_v52 = vrot.slane %v3988_v62, 5  ;;  %v2952_v41 = vcombine.low %v811_v15, %v814_v48  ;;  %v2114_v36 = vshll.u32 %v4240_v30, 16  ;;  %v2101_v21 = vor.u32 %v2100_v53, %v2097_v16  ;;  %v4272_v8 = vld [vmem:[%s3759_s5 + $0x34] sm:$0xf] }
  0x69   : > { %v2111_v28 = vor.u32 %v2110_v19, %v4246_v11  ;;  %v2128_v40 = vshll.u32 %v4253_v14, 16  ;;  %v2132_v43 = vshrl.u32 %v4253_v14, 16  ;;  %v859_v15 = vrot.slane %v4026_v37, 5 }
  0x6a   : > { %v4257_v62 = vsel %vm3953_vm7, %v2949_v34, %v852_v52  ;;  %v854_v26 = vrot.slane %v852_v52, 4  ;;  %v2152_v48 = vshll.u32 %v4272_v8, 16  ;;  %v2156_v34 = vshrl.u32 %v4272_v8, 16 }
  0x6b   : > { %v862_v16 = vrot.slane %v4035_v54, 5  ;;  %v2102_v53 = vrot.slane %v2101_v21, 4  ;;  %v2116_v52 = vrot.slane %v2114_v36, 5  ;;  %v2112_v37 = vrot.slane %v2111_v28, 4  ;;  %v4295_v36 = vld [vmem:[%s3759_s5 + $0x2c] sm:$0x1] }
  0x6c   : > { %v4269_v24 = vsel %vm3953_vm7, %v854_v26, %v855_v39  ;;  %v4291_v26 = vrot.slane %v2128_v40, 5  ;;  %v4302_v21 = vld [vmem:[%s3759_s5 + $0x38] sm:$0x1]  ;;  %v1117_v28 = vsel %vm516_vm0, %v4133_v6, 0 }
  0x6d   : > { %3382 = vmatmul.mubr.msk.bf16.vlgmr.msra.gmra.mrb[0].mxu0 %vm491_vm3, %v3621_v57  ;;  %v2122_v57 = vshll.u32 %v3115_v61, 16  ;;  %v3627_v40 = vld [vmem:[%s3759_s5 + $0x54] sm:$0xff]  }
  0x6e   : > { %3398 = vmatpush3.bf16.msra.mxu0 %v2337_v18  ;;  %3385 = vmatprep.mubr.msk.bf16.mxu0 %vm491_vm3, %v3623_v4  ;;  %v2143_v18 = vshrl.u32 %v3118_v55, 16  ;;  %v2950_v4 = vrot.slane %v788_v44, 9 }
  0x6f   : > { %3300 = vmatmul.mubr.msk.bf16.gmra.mrb[8].mxu1 %vm491_vm3, %v2932_v22  ;;  %3572 = vmatprep.subr.msk.bf16.mxu0 %vm516_vm0, %v4232_v38  ;;  %v2119_v22 = vshrl.u32 %v3115_v61, 16  ;;  %v861_v61 = vrot.slane %v859_v15, 4  ;;  %v2124_v54 = vrot.slane %v2122_v57, 5  ;;  %v2158_v57 = vrot.slane %v2156_v34, 4  ;;  %v3124_v34 = vld [vmem:[%s3759_s5 + $0x48] sm:$0xf] }
  0x70   : > { %3303 = vmatprep.mubr.msk.bf16.mxu1 %vm491_vm3, %v2933_v56  ;;  %v2146_v56 = vshll.u32 %v3118_v55, 16  ;;  %v4287_v19 = vsel %vm3953_vm7, %v2950_v4, %v859_v15  ;;  %v2134_v55 = vrot.slane %v2132_v43, 4  ;;  %v2145_v44 = vrot.slane %v2143_v18, 4  ;;  %v4313_v43 = vld [vmem:[%s3759_s5 + $0x40] sm:$0xf] }
  0x71   : > { %v2121_v39 = vrot.slane %v2119_v22, 4  ;;  %v4304_v22 = vrot.slane %v2152_v48, 5  ;;  %v3628_v18 = vld [vmem:[%s3759_s5 + $0x60] sm:$0xff]   ;;  %v2117_v4 = vsel %vm3798_vm4, %v2112_v37, %v2116_v52  ;;  %v2138_v48 = vshll.u32 %v4295_v36, 16 }
  0x72   : > { %v2191_v52 = vshrl.u32 %v3124_v34, 16  ;;  %v2194_v37 = vshll.u32 %v3124_v34, 16 }
  0x73   : > { %v2125_v15 = vor.u32 %v2124_v54, %v2121_v39  ;;  %v2159_v63 = vor.u32 %v2158_v57, %v4304_v22  ;;  %v3127_v57 = vld [vmem:[%s3759_s5 + $0x54] sm:$0xf] }
  0x74   : > { %v2193_v50 = vrot.slane %v2191_v52, 4  ;;  %v2218_v34 = vshll.u32 %v3127_v57, 16 }
  0x75   : > { %3386 = vmatmul.mubr.msk.bf16.gmra.mrb[4].mxu0 %vm491_vm3, %v3625_v20  ;;  %v2148_v20 = vrot.slane %v2146_v56, 5  ;;  %v2107_v56 = vsel %vm3798_vm4, %v2102_v53, %v4246_v11  ;;  %v2176_v11 = vshll.u32 %v4313_v43, 16  ;;  %v2180_v53 = vshrl.u32 %v4313_v43, 16 }
  0x76   : > { %3389 = vmatprep.mubr.msk.bf16.mxu0 %vm491_vm3, %v3626_v1  ;;  %v2162_v1 = vshll.u32 %v4302_v21, 16  ;;  %v3137_v54 = vcombine.low %v2107_v56, %v2117_v4  ;;  %v2160_v56 = vrot.slane %v2159_v63, 4  ;;  %v4360_v63 = vld [vmem:[%s3759_s5 + $0x50] sm:$0x1] }
  0x77   : > { %3304 = vmatmul.mubr.msk.bf16.gmra.mrb[12].mxu1 %vm491_vm3, %v2934_v10  ;;  %v4299_v10 = vsel %vm3953_vm7, %v861_v61, %v862_v16  ;;  %v4324_v16 = vld [vmem:[%s3759_s5 + $0x4c] sm:$0xf]  ;;  %v2135_v61 = vor.u32 %v2134_v55, %v4291_v26  ;;  %v2149_v6 = vor.u32 %v2148_v20, %v2145_v44  ;;  %v2126_v55 = vrot.slane %v2125_v15, 4 }
  0x78   : > { %3309 = vmatprep.mubr.msk.bf16.mxu1 %vm491_vm3, %v2952_v41  ;;  %v3121_v41 = vld [vmem:[%s3759_s5 + $0x3c] sm:$0xf]  ;;  %v2200_v39 = vshll.u32 %v4324_v16, 16  ;;  %v2140_v44 = vrot.slane %v2138_v48, 5  ;;  %v2204_v20 = vshrl.u32 %v4324_v16, 16  ;;  %v2164_v33 = vrot.slane %v2162_v1, 5 }
  0x79   : > { %v2167_v49 = vshrl.u32 %v3121_v41, 16  ;;  %v2170_v13 = vshll.u32 %v3121_v41, 16  ;;  %v2136_v41 = vrot.slane %v2135_v61, 4  ;;  %v4348_v15 = vrot.slane %v2176_v11, 5 }
  0x7a   : > { %v2182_v48 = vrot.slane %v2180_v53, 4  ;;  %v2215_v1 = vshrl.u32 %v3127_v57, 16  ;;  %v1386_v11 = vshll.u32 %v4074_v59, 16  ;;  %v2131_v53 = vsel %vm3798_vm4, %v2126_v55, %v4291_v26 }
  0x7b   : > { %v2169_v25 = vrot.slane %v2167_v49, 4  ;;  %v2172_v4 = vrot.slane %v2170_v13, 5  ;;  %v4357_v49 = vrot.slane %v2200_v39, 5  ;;  %v2206_v13 = vrot.slane %v2204_v20, 4 }
  0x7c   : > { %v2141_v52 = vsel %vm3798_vm4, %v2136_v41, %v2140_v44  ;;  %v2183_v57 = vor.u32 %v2182_v48, %v4348_v15  ;;  %v2165_v26 = vsel %vm3798_vm4, %v2160_v56, %v2164_v33  ;;  %v2217_v44 = vrot.slane %v2215_v1, 4  ;;  %v4398_v56 = vld [vmem:[%s3759_s5 + $0x5c] sm:$0x1] }
  0x7d   : > { %3390 = vmatmul.mubr.msk.bf16.gmra.mrb[8].mxu0 %vm491_vm3, %v3627_v40  ;;  %v2150_v40 = vrot.slane %v2149_v6, 4  ;;  %v2173_v20 = vor.u32 %v2172_v4, %v2169_v25  ;;  %v2207_v41 = vor.u32 %v2206_v13, %v4357_v49  ;;  %v4688_v33 = vcombine.low %v4184_v2, %v4199_v9 }
  0x7e   : > { %3393 = vmatprep.mubr.msk.bf16.mxu0 %vm491_vm3, %v3628_v18  ;;  %v3629_v18 = vld [vmem:[%s3759_s5 + $0x6c] sm:$0xff]   ;;  %v2239_v4 = vshrl.u32 %v3130_v7, 16  ;;  %v1390_v48 = vshrl.u32 %v4074_v59, 16  ;;  %v3138_v13 = vcombine.low %v2131_v53, %v2141_v52 }
  0x7f   : > { %3310 = vmatmul.mubr.msk.bf16.vlgmr.msra.gmra.mrb[0].mxu1 %vm491_vm3, %v2953_v27  ;;  %v4345_v27 = vld [vmem:[%s3759_s5 + $0x58] sm:$0xf]  ;;  %v2155_v39 = vsel %vm3798_vm4, %v2150_v40, %v4304_v22  ;;  %v4687_v22 = vcombine.low %v4178_v58, %v4190_v23  ;;  %v2220_v40 = vrot.slane %v2218_v34, 5  ;;  %v2242_v58 = vshll.u32 %v3130_v7, 16 }
  0x80   : > { %3326 = vmatpush3.bf16.msra.mxu1 %v1117_v28  ;;  %3313 = vmatprep.mubr.msk.bf16.mxu1 %vm491_vm3, %v2954_v29  ;;  %v3638_v28 = vld [vmem:[%s4671_s1 + $0x8] sm:$0x3]  ;;  %v2196_v29 = vrot.slane %v2194_v37, 5  ;;  %v2224_v61 = vshll.u32 %v4345_v27, 16  ;;  %v2228_v6 = vshrl.u32 %v4345_v27, 16  ;;  %v2591_v37 = vsel %vm516_vm0, %v4232_v38, 0 }
  0x81   : > { %3568 = vmatprep.subr.msk.bf16.mxu1 %vm516_vm0, %v3638_v28  ;;  %v2186_v28 = vshll.u32 %v4355_v46, 16  ;;  %v2210_v38 = vshll.u32 %v4360_v63, 16  ;;  %v2248_v23 = vshll.u32 %v4379_v60, 16  ;;  %v3139_v34 = vcombine.low %v2155_v39, %v2165_v26 }
  0x82   : > { %v2197_v55 = vor.u32 %v2196_v29, %v2193_v50  ;;  %v4391_v25 = vrot.slane %v2224_v61, 5  ;;  %v2174_v50 = vrot.slane %v2173_v20, 4  ;;  %v2184_v29 = vrot.slane %v2183_v57, 4 }
  0x83   : > { %v2188_v1 = vrot.slane %v2186_v28, 5  ;;  %v2212_v9 = vrot.slane %v2210_v38, 5  ;;  %v2208_v61 = vrot.slane %v2207_v41, 4  ;;  %v2234_v7 = vshll.u32 %v4398_v56, 16  ;;  %v4419_v28 = vld [vmem:[%s3759_s5 + $0x68] sm:$0x1] }
  0x84   : > { %v2198_v2 = vrot.slane %v2197_v55, 4  ;;  %v2241_v35 = vrot.slane %v2239_v4, 4  ;;  %v4409_v59 = vrot.slane %v2248_v23, 5  ;;  %v4411_v57 = vrot.slane %v1386_v11, 5 }
  0x85   : > { %3394 = vmatmul.mubr.msk.bf16.gmra.mrb[12].mxu0 %vm491_vm3, %v3629_v18  ;;  %v2230_v18 = vrot.slane %v2228_v6, 4  ;;  %v2221_v6 = vor.u32 %v2220_v40, %v2217_v44  ;;  %v1392_v53 = vrot.slane %v1390_v48, 4  ;;  %v2179_v52 = vsel %vm3798_vm4, %v2174_v50, %v4348_v15 }
  0x86   : > { %3399 = vmatprep.mubr.msk.bf16.mxu0 %vm491_vm3, %v3137_v54  ;;  %v2252_v54 = vshrl.u32 %v4379_v60, 16  ;;  %v2244_v60 = vrot.slane %v2242_v58, 5  ;;  %v2189_v39 = vsel %vm3798_vm4, %v2184_v29, %v2188_v1  ;;  %v2272_v38 = vshll.u32 %v4407_v12, 16  ;;  %v3630_v1 = vld [vmem:[%s3759_s5 + $0xc] sm:$0xff]  }
  0x87   : > { %3314 = vmatmul.mubr.msk.bf16.gmra.mrb[4].mxu1 %vm491_vm3, %v4687_v22  ;;  %v2231_v22 = vor.u32 %v2230_v18, %v4391_v25  ;;  %v2276_v44 = vshrl.u32 %v4407_v12, 16  ;;  %v4689_v11 = vcombine.low %v4218_v47, %v4236_v51  ;;  %v2203_v15 = vsel %vm3798_vm4, %v2198_v2, %v4357_v49 }
  0x88   : > { %3317 = vmatprep.mubr.msk.bf16.mxu1 %vm491_vm3, %v4688_v33  ;;  %v3133_v33 = vld [vmem:[%s3759_s5 + $0x6c] sm:$0xf]  ;;  %v2254_v20 = vrot.slane %v2252_v54, 4  ;;  %v2213_v41 = vsel %vm3798_vm4, %v2208_v61, %v2212_v9  ;;  %v2222_v40 = vrot.slane %v2221_v6, 4  ;;  %v2236_v18 = vrot.slane %v2234_v7, 5 }
  0x89   : > { %v2263_v26 = vshrl.u32 %v3133_v33, 16  ;;  %v2266_v55 = vshll.u32 %v3133_v33, 16  ;;  %v4690_v4 = vcombine.low %v4257_v62, %v4269_v24  ;;  %v2232_v47 = vrot.slane %v2231_v22, 4  ;;  %v3018_v22 = vld [vmem:[%s3759_s5 + $0x48] sm:$0xf] }
  0x8a   : > { %v2245_v51 = vor.u32 %v2244_v60, %v2241_v35  ;;  %v2258_v49 = vshll.u32 %v4419_v28, 16  ;;  %v1393_v58 = vor.u32 %v1392_v53, %v4411_v57  ;;  %v1396_v23 = vshll.u32 %v4077_v0, 16  ;;  %v4448_v60 = vld [vmem:[%s3759_s5 + $0x74] sm:$0x1] }
  0x8b   : > { %v3140_v54 = vcombine.low %v2179_v52, %v2189_v39  ;;  %v2265_v48 = vrot.slane %v2263_v26, 4  ;;  %v2268_v62 = vrot.slane %v2266_v55, 5  ;;  %v4442_v24 = vrot.slane %v2272_v38, 5 }
  0x8c   : > { %v2278_v50 = vrot.slane %v2276_v44, 4  ;;  %v3141_v29 = vcombine.low %v2203_v15, %v2213_v41  ;;  %v2227_v35 = vsel %vm3798_vm4, %v2222_v40, %v4391_v25  ;;  %v2246_v0 = vrot.slane %v2245_v51, 4  ;;  %v3632_v51 = vld [vmem:[%s3759_s5 + $0x24] sm:$0xff]  }
  0x8d   : > { %3400 = vmatmul.mubr.msk.bf16.vlgmr.msra.gmra.mrb[0].mxu0 %vm491_vm3, %v3138_v13  ;;  %v2237_v13 = vsel %vm3798_vm4, %v2232_v47, %v2236_v18  ;;  %v2260_v2 = vrot.slane %v2258_v49, 5  ;;  %v1394_v9 = vrot.slane %v1393_v58, 4  ;;  %v1398_v61 = vrot.slane %v1396_v23, 5 }
  0x8e   : > { %3416 = vmatpush3.bf16.msra.mxu0 %v2591_v37  ;;  %3403 = vmatprep.mubr.msk.bf16.mxu0 %vm491_vm3, %v3139_v34  ;;  %v2255_v37 = vor.u32 %v2254_v20, %v4409_v59  ;;  %v2486_v6 = vrot.slane %v4206_v31, 5  ;;  %v2269_v7 = vor.u32 %v2268_v62, %v2265_v48  ;;  %v2279_v33 = vor.u32 %v2278_v50, %v4442_v24  ;;  %v3153_v20 = vld [vmem:[%s3759_s5 + $0x18] sm:$0xe]  ;;  %v3155_v62 = vld [vmem:[%s3759_s5 + $0x30] sm:$0xe] }
  0x8f   : > { %3318 = vmatmul.mubr.msk.bf16.gmra.mrb[8].mxu1 %vm491_vm3, %v4689_v11  ;;  %v2282_v25 = vshll.u32 %v4448_v60, 16  ;;  %v4691_v53 = vcombine.low %v4287_v19, %v4299_v10  ;;  %v3142_v52 = vcombine.low %v2227_v35, %v2237_v13  ;;  %v2251_v31 = vsel %vm3798_vm4, %v2246_v0, %v4409_v59  ;;  %v3631_v59 = vld [vmem:[%s3759_s5 + $0x18] sm:$0xff]  }
  0x90   : > { %3321 = vmatprep.mubr.msk.bf16.mxu1 %vm491_vm3, %v4690_v4  ;;  %v2256_v34 = vrot.slane %v2255_v37, 4  ;;  %v1377_v26 = vshrl.u32 %v3018_v22, 16  ;;  %v1380_v55 = vshll.u32 %v3018_v22, 16  ;;  %v3161_v19 = vrot.slane %v3153_v20, 9  ;;  %v3015_v4 = vld [vmem:[%s3759_s5 + $0x3c] sm:$0xf] }
  0x91   : > { %v2488_v10 = vrot.slane %v2486_v6, 4  ;;  %v2489_v38 = vrot.slane %v4240_v30, 5  ;;  %v1399_v44 = vsel %vm3798_vm4, %v1394_v9, %v1398_v61  ;;  %v2270_v11 = vrot.slane %v2269_v7, 4  ;;  %v3154_v30 = vld [vmem:[%s3759_s5 + $0x24] sm:$0xe]  ;;  %v3633_v22 = vld [vmem:[%s3759_s5 + $0x30] sm:$0xff]  }
  0x92   : > { %v2261_v39 = vsel %vm3798_vm4, %v2256_v34, %v2260_v2  ;;  %v2280_v15 = vrot.slane %v2279_v33, 4  ;;  %v2284_v41 = vrot.slane %v2282_v25, 5  ;;  %v1379_v40 = vrot.slane %v1377_v26, 4  ;;  %v3634_v20 = vld [vmem:[%s3759_s5 + $0x3c] sm:$0xff]   ;;  %v3021_v26 = vld [vmem:[%s3759_s5 + $0x54] sm:$0xf] }
  0x93   : > { %v3143_v18 = vcombine.low %v2251_v31, %v2261_v39  ;;  %v1382_v47 = vrot.slane %v1380_v55, 5  ;;  %v2487_v37 = vsel %vm3953_vm7, %v3161_v19, %v2486_v6  ;;  %v2490_v49 = vsel %vm3953_vm7, %v2488_v10, %v2489_v38  ;;  %v3157_v38 = vld [vmem:[%s3759_s5 + $0x48] sm:$0xe] }
  0x94   : > { %v2493_v58 = vrot.slane %v4253_v14, 5  ;;  %v2285_v48 = vsel %vm3798_vm4, %v2280_v15, %v2284_v41  ;;  %v2500_v50 = vrot.slane %v4272_v8, 5  ;;  %v1356_v35 = vshll.u32 %v3015_v4, 16 }
  0x95   : > { %3404 = vmatmul.mubr.msk.bf16.gmra.mrb[4].mxu0 %vm491_vm3, %v3140_v54  ;;  %v1383_v23 = vor.u32 %v1382_v47, %v1379_v40  ;;  %v2275_v54 = vsel %vm3798_vm4, %v2270_v11, %v4442_v24  ;;  %v1362_v14 = vshll.u32 %v4056_v42, 16  ;;  %v3162_v24 = vrot.slane %v3154_v30, 9 }
  0x96   : > { %3407 = vmatprep.mubr.msk.bf16.mxu0 %vm491_vm3, %v3141_v29  ;;  %v1353_v29 = vshrl.u32 %v3015_v4, 16  ;;  %v2496_v8 = vrot.slane %v4295_v36, 5  ;;  %v3170_v0 = vcombine.low %v2487_v37, %v2490_v49  ;;  %v2495_v34 = vrot.slane %v2493_v58, 4  ;;  %v3635_v37 = vld [vmem:[%s3759_s5 + $0x48] sm:$0xff]  }
  0x97   : > { %3322 = vmatmul.mubr.msk.bf16.gmra.mrb[12].mxu1 %vm491_vm3, %v4691_v53  ;;  %v1384_v13 = vrot.slane %v1383_v23, 4  ;;  %v3163_v2 = vrot.slane %v3155_v62, 9  ;;  %v3144_v61 = vcombine.low %v2275_v54, %v2285_v48  ;;  %v2502_v6 = vrot.slane %v2500_v50, 4  ;;  %v3636_v23 = vld [vmem:[%s3759_s5 + $0x54] sm:$0xff]  }
  0x98   : > { %3327 = vmatprep.mubr.msk.bf16.mxu1 %vm491_vm3, %v3630_v1  ;;  %v1366_v1 = vshrl.u32 %v4056_v42, 16  ;;  %v2503_v42 = vrot.slane %v4302_v21, 5  ;;  %v1355_v7 = vrot.slane %v1353_v29, 4  ;;  %v1358_v33 = vrot.slane %v1356_v35, 5 }
  0x99   : > { %v1389_v9 = vsel %vm3798_vm4, %v1384_v13, %v4411_v57  ;;  %v4504_v25 = vrot.slane %v1362_v14, 5  ;;  %v2494_v53 = vsel %vm3953_vm7, %v3162_v24, %v2493_v58  ;;  %v2497_v57 = vsel %vm3953_vm7, %v2495_v34, %v2496_v8  ;;  %v3158_v24 = vld [vmem:[%s3759_s5 + $0x54] sm:$0xe]  ;;  %v4692_v8 = vld [vmem:[#allocation5_spill] sm:$0xff] }
  0x9a   : > { %v1368_v36 = vrot.slane %v1366_v1, 4  ;;  %v2501_v21 = vsel %vm3953_vm7, %v3163_v2, %v2500_v50  ;;  %v2507_v31 = vrot.slane %v4313_v43, 5  ;;  %v1372_v39 = vshll.u32 %v4059_v45, 16  ;;  %v3024_v50 = vld [vmem:[%s3759_s5 + $0x60] sm:$0xf] }
  0x9b   : > { %v2504_v55 = vsel %vm3953_vm7, %v2502_v6, %v2503_v42  ;;  %v1359_v19 = vor.u32 %v1358_v33, %v1355_v7  ;;  %v3171_v43 = vcombine.low %v2494_v53, %v2497_v57  ;;  %v2510_v11 = vrot.slane %v4355_v46, 5  ;;  %v4694_v33 = vld [vmem:[#allocation2_spill] sm:$0xff] }
  0x9c   : > { %v1369_v10 = vor.u32 %v1368_v36, %v4504_v25  ;;  %v1401_v15 = vshrl.u32 %v3021_v26, 16  ;;  %v1404_v41 = vshll.u32 %v3021_v26, 16  ;;  %v1410_v40 = vshll.u32 %v4085_v17, 16 }
  0x9d   : > { %3408 = vmatmul.mubr.msk.bf16.gmra.mrb[8].mxu0 %vm491_vm3, %v3142_v52  ;;  %v3156_v52 = vld [vmem:[%s3759_s5 + $0x3c] sm:$0xe]  ;;  %v2509_v4 = vrot.slane %v2507_v31, 4  ;;  %v1374_v47 = vrot.slane %v1372_v39, 5  ;;  %v2517_v58 = vrot.slane %v4360_v63, 5  ;;  %v2521_v63 = vrot.slane %v4345_v27, 5 }
  0x9e   : > { %3411 = vmatprep.mubr.msk.bf16.mxu0 %vm491_vm3, %v3143_v18  ;;  %v3164_v45 = vrot.slane %v3156_v52, 9  ;;  %v3172_v18 = vcombine.low %v2501_v21, %v2504_v55  ;;  %v1370_v49 = vrot.slane %v1369_v10, 4  ;;  %v1403_v46 = vrot.slane %v1401_v15, 4  ;;  %v3159_v27 = vld [vmem:[%s3759_s5 + $0x60] sm:$0xe] }
  0x9f   : > { %3328 = vmatmul.mubr.msk.bf16.vlgmr.msra.gmra.mrb[0].mxu1 %vm491_vm3, %v3631_v59  ;;  %v1414_v59 = vshrl.u32 %v4085_v17, 16  ;;  %v1406_v54 = vrot.slane %v1404_v41, 5  ;;  %v1412_v48 = vrot.slane %v1410_v40, 5  ;;  %v2511_v29 = vsel %vm3953_vm7, %v2509_v4, %v2510_v11  ;;  %v3637_v52 = vld [vmem:[%s3759_s5 + $0x60] sm:$0xff]  }
  0xa0   : > { %3434 = vmatpush3.bf16.msra.mxu1 %v3741_v3  ;;  %3331 = vmatprep.mubr.msk.bf16.mxu1 %vm491_vm3, %v3632_v51  ;;  %v4501_v3 = vcombine.low %v1389_v9, %v1399_v44  ;;  %v2514_v44 = vrot.slane %v4324_v16, 5  ;;  %v3165_v51 = vrot.slane %v3157_v38, 9  ;;  %v1360_v16 = vrot.slane %v1359_v19, 4  ;;  %v4693_v9 = vld [vmem:[#allocation3_spill] sm:$0xff] }
  0xa1   : > { %v1416_v62 = vrot.slane %v1414_v59, 4  ;;  %v2508_v17 = vsel %vm3953_vm7, %v3164_v45, %v2507_v31  ;;  %v1375_v1 = vsel %vm3798_vm4, %v1370_v49, %v1374_v47  ;;  %v1425_v34 = vshrl.u32 %v3024_v50, 16  ;;  %v3160_v47 = vld [vmem:[%s3759_s5 + $0x6c] sm:$0xe] }
  0xa2   : > { %v2516_v30 = vrot.slane %v2514_v44, 4  ;;  %v2515_v35 = vsel %vm3953_vm7, %v3165_v51, %v2514_v44  ;;  %v1365_v14 = vsel %vm3798_vm4, %v1360_v16, %v4504_v25  ;;  %v1428_v2 = vshll.u32 %v3024_v50, 16 }
  0xa3   : > { %v1438_v6 = vshrl.u32 %v4693_v9, 16  ;;  %v3173_v42 = vcombine.low %v2508_v17, %v2511_v29  ;;  %v1417_v7 = vor.u32 %v1416_v62, %v1412_v48  ;;  %v1420_v25 = vshll.u32 %v4694_v33, 16 }
  0xa4   : > { %v2518_v13 = vsel %vm3953_vm7, %v2516_v30, %v2517_v58  ;;  %v2523_v53 = vrot.slane %v2521_v63, 4  ;;  %v2524_v57 = vrot.slane %v4398_v56, 5  ;;  %v3032_v21 = vcombine.low %v1365_v14, %v1375_v1 }
  0xa5   : > { %3412 = vmatmul.mubr.msk.bf16.gmra.mrb[12].mxu0 %vm491_vm3, %v3144_v61  ;;  %v1434_v61 = vshll.u32 %v4693_v9, 16  ;;  %v3174_v36 = vcombine.low %v2515_v35, %v2518_v13  ;;  %v3167_v31 = vrot.slane %v3159_v27, 9  ;;  %v2531_v26 = vrot.slane %v4419_v28, 5 }
  0xa6   : > { %3417 = vmatprep.mubr.msk.bf16.mxu0 %vm491_vm3, %v3170_v0  ;;  %v2528_v0 = vrot.slane %v4692_v8, 5  ;;  %v1427_v55 = vrot.slane %v1425_v34, 4  ;;  %v1430_v19 = vrot.slane %v1428_v2, 5  ;;  %v1440_v38 = vrot.slane %v1438_v6, 4 }
  0xa7   : > { %3332 = vmatmul.mubr.msk.bf16.gmra.mrb[4].mxu1 %vm491_vm3, %v3633_v22  ;;  %v1407_v22 = vor.u32 %v1406_v54, %v1403_v46  ;;  %v1436_v10 = vrot.slane %v1434_v61, 5  ;;  %v1422_v45 = vrot.slane %v1420_v25, 5  ;;  %v2525_v28 = vsel %vm3953_vm7, %v2523_v53, %v2524_v57 }
  0xa8   : > { %3335 = vmatprep.mubr.msk.bf16.mxu1 %vm491_vm3, %v3634_v20  ;;  %v3166_v20 = vrot.slane %v3158_v24, 9  ;;  %v2530_v39 = vrot.slane %v2528_v0, 4  ;;  %v2529_v11 = vsel %vm3953_vm7, %v3167_v31, %v2528_v0  ;;  %v2535_v15 = vrot.slane %v4407_v12, 5  ;;  %v4600_v0 = vld [vmem:[%s4672_s2] ss:$0 sm:$0xff] }
  0xa9   : > { %v1408_v44 = vrot.slane %v1407_v22, 4  ;;  %v1431_v40 = vor.u32 %v1430_v19, %v1427_v55  ;;  %v1441_v59 = vor.u32 %v1440_v38, %v1436_v10  ;;  %v3168_v30 = vrot.slane %v3160_v47, 9 }
  0xaa   : > { %v2522_v56 = vsel %vm3953_vm7, %v3166_v20, %v2521_v63  ;;  %v2532_v41 = vsel %vm3953_vm7, %v2530_v39, %v2531_v26  ;;  %v2537_v12 = vrot.slane %v2535_v15, 4  ;;  %v2538_v58 = vrot.slane %v4448_v60, 5 }
  0xab   : > { %v1413_v51 = vsel %vm3798_vm4, %v1408_v44, %v1412_v48  ;;  %v3175_v16 = vcombine.low %v2522_v56, %v2525_v28  ;;  %v3176_v49 = vcombine.low %v2529_v11, %v2532_v41  ;;  %v1432_v46 = vrot.slane %v1431_v40, 4 }
  0xac   : > { %v1442_v54 = vrot.slane %v1441_v59, 4  ;;  %v2536_v48 = vsel %vm3953_vm7, %v3168_v30, %v2535_v15  ;;  %v2539_v50 = vsel %vm3953_vm7, %v2537_v12, %v2538_v58 }
  0xad   : > { %3418 = vmatmul.mubr.msk.bf16.vlgmr.msra.gmra.mrb[0].mxu0 %vm491_vm3, %v3171_v43  ;;  %v1418_v43 = vrot.slane %v1417_v7, 4  ;;  %v1437_v60 = vsel %vm3798_vm4, %v1432_v46, %v1436_v10  ;;  %v3177_v29 = vcombine.low %v2536_v48, %v2539_v50 }
  0xae   : > { %3421 = vmatprep.mubr.msk.bf16.mxu0 %vm491_vm3, %v3172_v18  ;;  %v4695_v18 = vld [vmem:[#allocation4_spill] sm:$0xff] }
  0xaf   : > { %3336 = vmatmul.mubr.msk.bf16.gmra.mrb[8].mxu1 %vm491_vm3, %v3635_v37  ;;  %v1444_v4 = vshll.u32 %v4695_v18, 16  ;;  %v1423_v37 = vsel %vm3798_vm4, %v1418_v43, %v1422_v45 }
  0xb0   : > { %3339 = vmatprep.mubr.msk.bf16.mxu1 %vm491_vm3, %v3636_v23  ;;  %v3034_v23 = vcombine.low %v1413_v51, %v1423_v37 }
  0xb1   : > { %v1446_v62 = vrot.slane %v1444_v4, 5 }
  0xb3   : > { %v1447_v17 = vsel %vm3798_vm4, %v1442_v54, %v1446_v62 }
  0xb4   : > { %v3035_v35 = vcombine.low %v1437_v60, %v1447_v17 }
  0xb5   : > { %3422 = vmatmul.mubr.msk.bf16.gmra.mrb[4].mxu0 %vm491_vm3, %v3173_v42 }
  0xb6   : > { %3425 = vmatprep.mubr.msk.bf16.mxu0 %vm491_vm3, %v3174_v36 }
  0xb7   : > { %3340 = vmatmul.mubr.msk.bf16.gmra.mrb[12].mxu1 %vm491_vm3, %v3637_v52 }
  0xb8   : > { %3353 = vmatprep.mubr.msk.bf16.mxu1 %vm491_vm3, %v3032_v21 }
  0xbd   : > { %3426 = vmatmul.mubr.msk.bf16.gmra.mrb[8].mxu0 %vm491_vm3, %v3175_v16 }
  0xbe   : > { %3429 = vmatprep.mubr.msk.bf16.mxu0 %vm491_vm3, %v3176_v49 }
  0xbf   : > { %3354 = vmatmul.mubr.msk.bf16.vlgmr.msra.gmra.mrb[8].mxu1 %vm491_vm3, %v4501_v3 }
  0xc0   : > { %3357 = vmatprep.mubr.msk.bf16.mxu1 %vm491_vm3, %v3034_v23 }
  0xc5   : > { %3430 = vmatmul.mubr.msk.bf16.gmra.mrb[12].mxu0 %vm491_vm3, %v3177_v29 }
  0xc7   : > { %3358 = vmatmul.mubr.msk.bf16.gmra.mrb[12].mxu1 %vm491_vm3, %v3035_v35 }
 0x172   : > { %v3329_v3 = vpop.f32.mrb[0].mxu1 }
 0x173   : > { %v1153_v63 = vpop.f32.mrb[1].mxu1 }
 0x174   : > { %v3330_v14 = vpop.f32.mrb[2].mxu1 }
 0x175   : > { %v1156_v5 = vpop.f32.mrb[3].mxu1 }
 0x17a   : > { %v3333_v1 = vpop.f32.mrb[4].mxu1 }
 0x17b   : > { %v1169_v13 = vpop.f32.mrb[5].mxu1 }
 0x17c   : > { %v3334_v24 = vpop.f32.mrb[6].mxu1 }
 0x17d   : > { %v1172_v32 = vpop.f32.mrb[7].mxu1 }
 0x180   : > { %v3419_v8 = vpop.f32.mrb[0].mxu0 }
 0x181   : > { %v3435_v27 = vadd.f32 %v3419_v8, %v3329_v3  ;;  %v2627_v34 = vpop.f32.mrb[1].mxu0 }
 0x182   : > { %v3436_v2 = vadd.f32 %v2627_v34, %v1153_v63  ;;  %v3420_v9 = vpop.f32.mrb[2].mxu0 }
 0x183   : > { %v2715_v61 = vadd.f32 %v3435_v27, %v4600_v0  ;;  %v3437_v6 = vadd.f32 %v3420_v9, %v3330_v14  ;;  %v2630_v42 = vpop.f32.mrb[3].mxu0 }
 0x184   : > { %v2713_v22 = vadd.f32 %v3436_v2, %v4600_v0  ;;  %v3438_v7 = vadd.f32 %v2630_v42, %v1156_v5 }
 0x185   : > { %v2731_v33 = vmax.f32 %v2715_v61, 0.0  ;;  %v2716_v25 = vadd.f32 %v3437_v6, %v4600_v0 }
 0x186   : > { %v2729_v36 = vmax.f32 %v2713_v22, 0.0  ;;  %v2714_v20 = vadd.f32 %v3438_v7, %v4600_v0 }
 0x187   : > { %2748 = vst.msk [vmem:[%s4606_s13 + $0x10] sm:$0xff] %vm2745_vm8, %v2731_v33  ;;  %v2732_v53 = vmax.f32 %v2716_v25, 0.0 }
 0x188   : > { %2746 = vst.msk [vmem:[%s4606_s13] sm:$0xff] %vm2745_vm8, %v2729_v36  ;;  %v2730_v57 = vmax.f32 %v2714_v20, 0.0  ;;  %v3423_v52 = vpop.f32.mrb[4].mxu0 }
 0x189   : > { %2749 = vst.msk [vmem:[%s4606_s13 + $0x18] sm:$0xff] %vm2745_vm8, %v2732_v53  ;;  %v3439_v21 = vadd.f32 %v3423_v52, %v3333_v1  ;;  %v2643_v31 = vpop.f32.mrb[5].mxu0 }
 0x18a   : > { %2747 = vst.msk [vmem:[%s4606_s13 + $0x8] sm:$0xff] %vm2745_vm8, %v2730_v57  ;;  %v3440_v39 = vadd.f32 %v2643_v31, %v1169_v13  ;;  %v3424_v26 = vpop.f32.mrb[6].mxu0 }
 0x18b   : > { %v2719_v55 = vadd.f32 %v3439_v21, %v4600_v0  ;;  %v3441_v19 = vadd.f32 %v3424_v26, %v3334_v24  ;;  %v2646_v10 = vpop.f32.mrb[7].mxu0 }
 0x18c   : > { %v2717_v38 = vadd.f32 %v3440_v39, %v4600_v0  ;;  %v3442_v44 = vadd.f32 %v2646_v10, %v1172_v32 }
 0x18d   : > { %v2735_v43 = vmax.f32 %v2719_v55, 0.0  ;;  %v2720_v45 = vadd.f32 %v3441_v19, %v4600_v0 }
 0x18e   : > { %v2733_v56 = vmax.f32 %v2717_v38, 0.0  ;;  %v2718_v28 = vadd.f32 %v3442_v44, %v4600_v0 }
 0x18f   : > { %2752 = vst.msk [vmem:[%s4606_s13 + $0x30] sm:$0xff] %vm2745_vm8, %v2735_v43  ;;  %v2736_v11 = vmax.f32 %v2720_v45, 0.0 }
 0x190   : > { %2750 = vst.msk [vmem:[%s4606_s13 + $0x20] sm:$0xff] %vm2745_vm8, %v2733_v56  ;;  %v2734_v15 = vmax.f32 %v2718_v28, 0.0  ;;  %v3427_v41 = vpop.f32.mrb[8].mxu0 }
 0x191   : > { %2753 = vst.msk [vmem:[%s4606_s13 + $0x38] sm:$0xff] %vm2745_vm8, %v2736_v11  ;;  %v2659_v59 = vpop.f32.mrb[9].mxu0 }
 0x192   : > { %v3355_v40 = vpop.f32.mrb[8].mxu1  ;;  %2751 = vst.msk [vmem:[%s4606_s13 + $0x28] sm:$0xff] %vm2745_vm8, %v2734_v15  ;;  %v3428_v47 = vpop.f32.mrb[10].mxu0 }
 0x193   : > { %v3443_v18 = vadd.f32 %v3427_v41, %v3355_v40  ;;  %v1567_v4 = vpop.f32.mrb[9].mxu1  ;;  %v2662_v16 = vpop.f32.mrb[11].mxu0 }
 0x194   : > { %v3444_v51 = vadd.f32 %v2659_v59, %v1567_v4  ;;  %v3356_v37 = vpop.f32.mrb[10].mxu1 }
 0x195   : > { %v2723_v49 = vadd.f32 %v3443_v18, %v4600_v0  ;;  %v3445_v30 = vadd.f32 %v3428_v47, %v3356_v37  ;;  %v1570_v12 = vpop.f32.mrb[11].mxu1 }
 0x196   : > { %v2721_v58 = vadd.f32 %v3444_v51, %v4600_v0  ;;  %v3446_v23 = vadd.f32 %v2662_v16, %v1570_v12 }
 0x197   : > { %v2739_v46 = vmax.f32 %v2723_v49, 0.0  ;;  %v2724_v54 = vadd.f32 %v3445_v30, %v4600_v0 }
 0x198   : > { %v2737_v62 = vmax.f32 %v2721_v58, 0.0  ;;  %v2722_v48 = vadd.f32 %v3446_v23, %v4600_v0  ;;  %v3431_v60 = vpop.f32.mrb[12].mxu0 }
 0x199   : > { %2756 = vst.msk [vmem:[%s4606_s13 + $0x50] sm:$0xff] %vm2745_vm8, %v2739_v46  ;;  %v2740_v50 = vmax.f32 %v2724_v54, 0.0  ;;  %v2675_v35 = vpop.f32.mrb[13].mxu0 }
 0x19a   : > { %2754 = vst.msk [vmem:[%s4606_s13 + $0x40] sm:$0xff] %vm2745_vm8, %v2737_v62  ;;  %v2738_v17 = vmax.f32 %v2722_v48, 0.0  ;;  %v3359_v29 = vpop.f32.mrb[12].mxu1  ;;  %v3432_v14 = vpop.f32.mrb[14].mxu0 }
 0x19b   : > { %2757 = vst.msk [vmem:[%s4606_s13 + $0x58] sm:$0xff] %vm2745_vm8, %v2740_v50  ;;  %v3447_v3 = vadd.f32 %v3431_v60, %v3359_v29  ;;  %v1583_v63 = vpop.f32.mrb[13].mxu1  ;;  %v2678_v13 = vpop.f32.mrb[15].mxu0 }
 0x19c   : > { %2755 = vst.msk [vmem:[%s4606_s13 + $0x48] sm:$0xff] %vm2745_vm8, %v2738_v17  ;;  %v3448_v5 = vadd.f32 %v2675_v35, %v1583_v63  ;;  %v3360_v1 = vpop.f32.mrb[14].mxu1 }
 0x19d   : > { %v2727_v24 = vadd.f32 %v3447_v3, %v4600_v0  ;;  %v3449_v32 = vadd.f32 %v3432_v14, %v3360_v1  ;;  %v1586_v8 = vpop.f32.mrb[15].mxu1 }
 0x19e   : > { %v2725_v27 = vadd.f32 %v3448_v5, %v4600_v0  ;;  %v3450_v34 = vadd.f32 %v2678_v13, %v1586_v8 }
 0x19f   : > { %v2743_v2 = vmax.f32 %v2727_v24, 0.0  ;;  %v2728_v9 = vadd.f32 %v3449_v32, %v4600_v0 }
 0x1a0   : > { %v2741_v61 = vmax.f32 %v2725_v27, 0.0  ;;  %v2726_v6 = vadd.f32 %v3450_v34, %v4600_v0 }
 0x1a1   : > { %2760 = vst.msk [vmem:[%s4606_s13 + $0x70] sm:$0xff] %vm2745_vm8, %v2743_v2  ;;  %v2744_v42 = vmax.f32 %v2728_v9, 0.0 }
 0x1a2   : > { %2758 = vst.msk [vmem:[%s4606_s13 + $0x60] sm:$0xff] %vm2745_vm8, %v2741_v61  ;;  %v2742_v22 = vmax.f32 %v2726_v6, 0.0 }
 0x1a3   : > { %2761 = vst.msk [vmem:[%s4606_s13 + $0x78] sm:$0xff] %vm2745_vm8, %v2744_v42 }
 0x1a4   : > { %2759 = vst.msk [vmem:[%s4606_s13 + $0x68] sm:$0xff] %vm2745_vm8, %v2742_v22 }
 0x1a5 PF: > { %s13_s16 = sadd.s32 1, %s3677_s16   ;;  %s4696_s12 = smov %s3669_s14 }
 0x1a6   : > { %p10_p7 = scmp.ge.s32.totalorder %s13_s16, 6   ;;  %s4697_s13 = smov %s3673_s15 }
 0x1a7   : > { %s4698_s14 = smov %s4701_s17  ;;  %s4699_s15 = smov %s4705_s18 }
 0x1a8   :  { %12 = sbr.rel (!%p10_p7) target bundleno = 3 (0x3), region = 79 }

</bundles_post_ra>
